<compile_context>
chip_gen: v6e
topology: v6e:2x2x1
jax: 0.10.0
libtpu: 0.0.40
codegen_flags: <defaults>
</compile_context>

<pallas_src>
import functools
import math

import jax
import jax.numpy as jnp
from jax.experimental import pallas as pl
from jax.experimental.pallas import tpu as pltpu


# --------------------------------------------------------------------------
# Fused forward kernel
# --------------------------------------------------------------------------

def _make_fwd_kernel(*, n_layer, n_head, block_size, eps, with_loss):
    def kernel(cond_ref, bv_ref, tokw_ref, tokb_ref, pos_ref, mask_ref,
               attn_nw_ref, wqkv_ref, wo_ref, ffn_nw_ref, w13_ref, w2_ref,
               normw_ref, outw_ref, outb_ref, *rest):
        if with_loss:
            tgt_ref, logits_ref, loss_ref = rest
        else:
            (logits_ref,) = rest

        B, n_cond, D = cond_ref.shape
        _, Tin, _Din = bv_ref.shape
        S = n_cond + Tin
        hd = D // n_head
        Fh = w2_ref.shape[1]
        n_out = S - block_size
        scale = 1.0 / float(hd) ** 0.5

        # ---- embedding: tok_eb linear + concat(cond) + pos add (eval dropout) ----
        pos = pos_ref[...]
        rows = []
        for b in range(B):                                  # static unroll (B tiny)
            tok_b = jnp.dot(bv_ref[b], tokw_ref[...],
                            preferred_element_type=jnp.float32) + tokb_ref[...]
            rows.append(jnp.concatenate(
                [cond_ref[b].astype(jnp.float32), tok_b], axis=0) + pos)
        h = jnp.concatenate(rows, axis=0)                   # (B*S, D) fp32, batch-flattened

        mask = mask_ref[...]                                # (B*H*S, B*H*S) additive mask

        for l in range(n_layer):                            # static unroll over layers
            # ---- attention (pre-RMSNorm), one fused QKV matmul over all B*S rows ----
            xn = h * jax.lax.rsqrt(jnp.mean(h * h, axis=-1, keepdims=True) + eps)
            xn = (xn * attn_nw_ref[l]).astype(jnp.bfloat16)
            qkv = jnp.dot(xn, wqkv_ref[l], preferred_element_type=jnp.float32)  # (B*S, 3D)

            # Repack to (B*H*S, hd): rows grouped by (batch, head).
            qs, ks, vs = [], [], []
            for b in range(B):
                r0 = b * S
                for hh in range(n_head):
                    c0 = hh * hd
                    qs.append(qkv[r0:r0 + S, c0:c0 + hd])
                    ks.append(qkv[r0:r0 + S, D + c0:D + c0 + hd])
                    vs.append(qkv[r0:r0 + S, 2 * D + c0:2 * D + c0 + hd])
            q = (jnp.concatenate(qs, axis=0) * scale).astype(jnp.bfloat16)
            k = jnp.concatenate(ks, axis=0).astype(jnp.bfloat16)
            v = jnp.concatenate(vs, axis=0).astype(jnp.bfloat16)

            # One block-masked score matmul + one PV matmul for ALL (batch, head) pairs.
            s = jax.lax.dot_general(q, k, (((1,), (1,)), ((), ())),
                                    preferred_element_type=jnp.float32) + mask
            s = s - jnp.max(s, axis=-1, keepdims=True)
            p = jnp.exp(s)
            p = p * pl.reciprocal(jnp.sum(p, axis=-1, keepdims=True), approx=True)
            o = jnp.dot(p.astype(jnp.bfloat16), v,
                        preferred_element_type=jnp.float32)            # (B*H*S, hd)

            # Back to (B*S, D) and a single output projection + residual.
            obs = []
            for b in range(B):
                heads = [o[(b * n_head + hh) * S:(b * n_head + hh + 1) * S, :]
                         for hh in range(n_head)]
                obs.append(jnp.concatenate(heads, axis=-1))
            o = jnp.concatenate(obs, axis=0).astype(jnp.bfloat16)      # (B*S, D)
            h = h + jnp.dot(o, wo_ref[l], preferred_element_type=jnp.float32)

            # ---- SwiGLU FFN: w1 & w3 fused into one (D, 2*Fh) matmul ----
            xn = h * jax.lax.rsqrt(jnp.mean(h * h, axis=-1, keepdims=True) + eps)
            xn = (xn * ffn_nw_ref[l]).astype(jnp.bfloat16)
            h13 = jnp.dot(xn, w13_ref[l], preferred_element_type=jnp.float32)  # (B*S, 2Fh)
            hs = (jax.nn.silu(h13[:, :Fh]) * h13[:, Fh:]).astype(jnp.bfloat16)
            h = h + jnp.dot(hs, w2_ref[l], preferred_element_type=jnp.float32)

        # ---- head: final RMSNorm + output proj (drop last prediction block) [+ BCE] ----
        ho = jnp.concatenate([h[b * S:b * S + n_out, :] for b in range(B)], axis=0)
        xo = ho * jax.lax.rsqrt(jnp.mean(ho * ho, axis=-1, keepdims=True) + eps)
        xo = (xo * normw_ref[...]).astype(jnp.bfloat16)
        lg = jnp.dot(xo, outw_ref[...],
                     preferred_element_type=jnp.float32) + outb_ref[...]   # (B*n_out, Din)
        for b in range(B):
            lgb = lg[b * n_out:(b + 1) * n_out, :]
            logits_ref[b] = lgb
            if with_loss:
                t = tgt_ref[b].astype(jnp.float32)
                # stable binary_cross_entropy_with_logits, reduction='none'
                loss_ref[b] = (jnp.maximum(lgb, 0.0) - lgb * t
                               + jnp.log1p(jnp.exp(-jnp.abs(lgb))))

    return kernel


# --------------------------------------------------------------------------
# Wrapper
# --------------------------------------------------------------------------

def _block_group_mask(B, H, S, bs):
    """Additive mask for the (B*H*S, B*H*S) flattened attention: rows may attend to
    columns only within the same (batch, head) group AND block-causally within S."""
    r = jnp.arange(B * H * S, dtype=jnp.int32)
    grp = r // S
    pos = r % S
    same_grp = grp[:, None] == grp[None, :]
    causal = (pos[:, None] // bs) >= (pos[None, :] // bs)
    return jnp.where(same_grp & causal, 0.0, -1e30).astype(jnp.float32)


def transformer_bin_forward(params, binary_vec, cond_idx, cfg, targets=None):
    """Training-style forward: binary_vec + cond_idx given, input_pos=None."""
    B, Tin, Din = binary_vec.shape
    bs = cfg["block_size"]
    D, H, L = cfg["dim"], cfg["n_head"], cfg["n_layer"]
    n_cond = cfg["cls_token_num"] * bs
    S = n_cond + Tin
    n_out = S - bs
    Fh = cfg["ffn_hidden"]
    hd = D // H

    # LabelEmbedder (eval / class_dropout_prob=0): table lookup -> (B, cls_token_num, D),
    # then repeat_interleave(block_size, dim=1).
    cond = params["cls_emb"][cond_idx][:, None, :][:, :cfg["cls_token_num"], :]
    cond = jnp.repeat(cond, bs, axis=1).astype(jnp.float32)        # (B, n_cond, D)

    mask = _block_group_mask(B, H, S, bs)                          # constant, folded by XLA

    with_loss = targets is not None
    kernel = _make_fwd_kernel(n_layer=L, n_head=H, block_size=bs,
                              eps=cfg["eps"], with_loss=with_loss)

    args = [cond, binary_vec.astype(jnp.bfloat16),
            params["tok_eb_w"], params["tok_eb_b"], params["pos_emb"][:S], mask,
            params["attn_norm_w"], params["wqkv"], params["wo"],
            params["ffn_norm_w"], params["w13"], params["w2"],
            params["norm_w"], params["out_w"], params["out_b"]]
    out_shapes = [jax.ShapeDtypeStruct((B, n_out, Din), jnp.float32)]
    if with_loss:
        args.append(targets.astype(jnp.float32))
        out_shapes.append(jax.ShapeDtypeStruct((B, n_out, Din), jnp.float32))

    G, BS = B * H * S, B * S
    flops = (2 * B * Tin * Din * D
             + L * (2 * BS * D * 3 * D + 4 * G * G * hd + 2 * BS * D * D
                    + 2 * BS * D * 2 * Fh + 2 * BS * Fh * D)
             + 2 * B * n_out * D * Din)
    transcendentals = L * (G * G + BS * Fh) + (2 * B * n_out * Din if with_loss else 0)
    bytes_accessed = (sum(math.prod(a.shape) * a.dtype.itemsize for a in args)
                      + sum(math.prod(o.shape) * 4 for o in out_shapes))

    outs = pl.pallas_call(
        kernel,
        out_shape=tuple(out_shapes),
        compiler_params=pltpu.CompilerParams(vmem_limit_bytes=32 * 1024 * 1024),
        cost_estimate=pl.CostEstimate(flops=flops, transcendentals=transcendentals,
                                      bytes_accessed=bytes_accessed),
    )(*args)

    if with_loss:
        logits, loss = outs
    else:
        (logits,) = outs
        loss = None
    return logits, loss


# --------------------------------------------------------------------------
# Parameters
# --------------------------------------------------------------------------

def init_params(key, cfg):
    D, Din = cfg["dim"], cfg["input_dim"]
    L = cfg["n_layer"]
    S = cfg["seq_len"] + cfg["block_size"]
    Fh = cfg["ffn_hidden"]
    keys = jax.random.split(key, 4 + L)

    def rn(k, shape, s=0.02):
        return jax.random.normal(k, shape, jnp.float32) * s

    params = {
        "cls_emb": rn(keys[0], (cfg["num_classes"], D)),    # class_dropout_prob = 0
        "pos_emb": rn(keys[1], (S, D), D ** -0.5),
        "tok_eb_w": rn(keys[2], (Din, D)).astype(jnp.bfloat16),
        "tok_eb_b": jnp.zeros((1, D), jnp.float32),
        "out_w": rn(keys[3], (D, Din)).astype(jnp.bfloat16),
        "out_b": jnp.zeros((1, Din), jnp.float32),
        "norm_w": jnp.ones((1, D), jnp.float32),
        "attn_norm_w": jnp.ones((L, 1, D), jnp.float32),
        "ffn_norm_w": jnp.ones((L, 1, D), jnp.float32),
    }
    wqkv, wo, w13, w2 = [], [], [], []
    for i in range(L):
        lk = jax.random.split(keys[4 + i], 7)
        wqkv.append(jnp.concatenate(
            [rn(lk[0], (D, D)), rn(lk[1], (D, D)), rn(lk[2], (D, D))], axis=1))
        wo.append(rn(lk[3], (D, D)))
        w13.append(jnp.concatenate([rn(lk[4], (D, Fh)), rn(lk[5], (D, Fh))], axis=1))
        w2.append(rn(lk[6], (Fh, D)))
    params["wqkv"] = jnp.stack(wqkv).astype(jnp.bfloat16)   # (L, D, 3D) fused QKV
    params["wo"] = jnp.stack(wo).astype(jnp.bfloat16)       # (L, D, D)
    params["w13"] = jnp.stack(w13).astype(jnp.bfloat16)     # (L, D, 2*Fh) fused w1|w3
    params["w2"] = jnp.stack(w2).astype(jnp.bfloat16)       # (L, Fh, D)
    return params


# --------------------------------------------------------------------------
# Main
# --------------------------------------------------------------------------

if __name__ == "__main__":
    cfg = dict(
        dim=32, n_head=4, n_layer=2,
        input_dim=16, seq_len=8, block_size=4,
        cls_token_num=1, num_classes=10,
        eps=1e-5, ffn_hidden=64,
    )

    params = init_params(jax.random.PRNGKey(0), cfg)

    kin, kcond, ktgt = jax.random.split(jax.random.PRNGKey(0), 3)
    B = 2
    binary_vec = jax.random.bernoulli(
        kin, 0.5, (B, cfg["seq_len"], cfg["input_dim"])).astype(jnp.float32)
    cond_idx = jax.random.randint(kcond, (B,), 0, cfg["num_classes"])
    targets = jax.random.bernoulli(
        ktgt, 0.5, (B, cfg["seq_len"], cfg["input_dim"])).astype(jnp.float32)

    fwd = jax.jit(functools.partial(transformer_bin_forward, cfg=cfg))
    logits, loss = fwd(params, binary_vec, cond_idx, targets=targets)
    jax.block_until_ready((logits, loss))

    assert logits.shape == (B, cfg["seq_len"], cfg["input_dim"])
    assert logits.dtype == jnp.float32
    assert loss.shape == logits.shape
    assert bool(jnp.all(jnp.isfinite(logits)))
    assert bool(jnp.all(jnp.isfinite(loss)))
    print("KERNEL_OK")
</pallas_src>

<mosaic_0001>
module attributes {stable_mosaic.version = 11 : i64} {
  func.func @kernel(%arg0: memref<2x4x32xf32, #tpu.memory_space<vmem>>, %arg1: memref<2x8x16xbf16, #tpu.memory_space<vmem>>, %arg2: memref<16x32xbf16, #tpu.memory_space<vmem>>, %arg3: memref<1x32xf32, #tpu.memory_space<vmem>>, %arg4: memref<12x32xf32, #tpu.memory_space<vmem>>, %arg5: memref<96x96xf32, #tpu.memory_space<vmem>>, %arg6: memref<2x1x32xf32, #tpu.memory_space<vmem>>, %arg7: memref<2x32x96xbf16, #tpu.memory_space<vmem>>, %arg8: memref<2x32x32xbf16, #tpu.memory_space<vmem>>, %arg9: memref<2x1x32xf32, #tpu.memory_space<vmem>>, %arg10: memref<2x32x128xbf16, #tpu.memory_space<vmem>>, %arg11: memref<2x64x32xbf16, #tpu.memory_space<vmem>>, %arg12: memref<1x32xf32, #tpu.memory_space<vmem>>, %arg13: memref<32x16xbf16, #tpu.memory_space<vmem>>, %arg14: memref<1x16xf32, #tpu.memory_space<vmem>>, %arg15: memref<2x8x16xf32, #tpu.memory_space<vmem>>, %arg16: memref<2x8x16xf32, #tpu.memory_space<vmem>>, %arg17: memref<2x8x16xf32, #tpu.memory_space<vmem>>) attributes {dimension_semantics = [], scalar_prefetch = 0 : i64, scratch_operands = 0 : i64, tpu.core_type = #tpu.core_type<tc>} {
    %c0 = arith.constant 0 : index
    %c0_0 = arith.constant 0 : index
    %0 = vector.load %arg4[%c0, %c0_0] : memref<12x32xf32, #tpu.memory_space<vmem>>, vector<12x32xf32>
    %c0_1 = arith.constant 0 : index
    %c0_2 = arith.constant 0 : index
    %c0_3 = arith.constant 0 : index
    %1 = vector.load %arg1[%c0_1, %c0_2, %c0_3] : memref<2x8x16xbf16, #tpu.memory_space<vmem>>, vector<1x8x16xbf16>
    %2 = vector.shape_cast %1 : vector<1x8x16xbf16> to vector<8x16xbf16>
    %c0_4 = arith.constant 0 : index
    %c0_5 = arith.constant 0 : index
    %3 = vector.load %arg2[%c0_4, %c0_5] : memref<16x32xbf16, #tpu.memory_space<vmem>>, vector<16x32xbf16>
    %cst = arith.constant dense<0.000000e+00> : vector<8x32xf32>
    %4 = tpu.matmul %2, %3, %cst {dimension_numbers = #tpu.dot_dimension_numbers<[1], [0], [0], [1], [0, 0, 1, 1], [], []>} : vector<8x16xbf16>, vector<16x32xbf16>, vector<8x32xf32> -> vector<8x32xf32>
    %c0_6 = arith.constant 0 : index
    %c0_7 = arith.constant 0 : index
    %5 = vector.load %arg3[%c0_6, %c0_7] : memref<1x32xf32, #tpu.memory_space<vmem>>, vector<1x32xf32>
    %6 = vector.broadcast %5 : vector<1x32xf32> to vector<8x32xf32>
    %7 = arith.addf %4, %6 : vector<8x32xf32>
    %c0_8 = arith.constant 0 : index
    %c0_9 = arith.constant 0 : index
    %c0_10 = arith.constant 0 : index
    %8 = vector.load %arg0[%c0_8, %c0_9, %c0_10] : memref<2x4x32xf32, #tpu.memory_space<vmem>>, vector<1x4x32xf32>
    %9 = vector.shape_cast %8 : vector<1x4x32xf32> to vector<4x32xf32>
    %10 = tpu.concatenate %9, %7 in 0 : vector<4x32xf32>, vector<8x32xf32> -> vector<12x32xf32>
    %11 = arith.addf %10, %0 : vector<12x32xf32>
    %c1 = arith.constant 1 : index
    %c0_11 = arith.constant 0 : index
    %c0_12 = arith.constant 0 : index
    %12 = vector.load %arg1[%c1, %c0_11, %c0_12] : memref<2x8x16xbf16, #tpu.memory_space<vmem>>, vector<1x8x16xbf16>
    %13 = vector.shape_cast %12 : vector<1x8x16xbf16> to vector<8x16xbf16>
    %c0_13 = arith.constant 0 : index
    %c0_14 = arith.constant 0 : index
    %14 = vector.load %arg2[%c0_13, %c0_14] : memref<16x32xbf16, #tpu.memory_space<vmem>>, vector<16x32xbf16>
    %cst_15 = arith.constant dense<0.000000e+00> : vector<8x32xf32>
    %15 = tpu.matmul %13, %14, %cst_15 {dimension_numbers = #tpu.dot_dimension_numbers<[1], [0], [0], [1], [0, 0, 1, 1], [], []>} : vector<8x16xbf16>, vector<16x32xbf16>, vector<8x32xf32> -> vector<8x32xf32>
    %c0_16 = arith.constant 0 : index
    %c0_17 = arith.constant 0 : index
    %16 = vector.load %arg3[%c0_16, %c0_17] : memref<1x32xf32, #tpu.memory_space<vmem>>, vector<1x32xf32>
    %17 = vector.broadcast %16 : vector<1x32xf32> to vector<8x32xf32>
    %18 = arith.addf %15, %17 : vector<8x32xf32>
    %c1_18 = arith.constant 1 : index
    %c0_19 = arith.constant 0 : index
    %c0_20 = arith.constant 0 : index
    %19 = vector.load %arg0[%c1_18, %c0_19, %c0_20] : memref<2x4x32xf32, #tpu.memory_space<vmem>>, vector<1x4x32xf32>
    %20 = vector.shape_cast %19 : vector<1x4x32xf32> to vector<4x32xf32>
    %21 = tpu.concatenate %20, %18 in 0 : vector<4x32xf32>, vector<8x32xf32> -> vector<12x32xf32>
    %22 = arith.addf %21, %0 : vector<12x32xf32>
    %23 = tpu.concatenate %11, %22 in 0 : vector<12x32xf32>, vector<12x32xf32> -> vector<24x32xf32>
    %c0_21 = arith.constant 0 : index
    %c0_22 = arith.constant 0 : index
    %24 = vector.load %arg5[%c0_21, %c0_22] : memref<96x96xf32, #tpu.memory_space<vmem>>, vector<96x96xf32>
    %25 = arith.mulf %23, %23 : vector<24x32xf32>
    %cst_23 = arith.constant dense<0.000000e+00> : vector<24xf32>
    %26 = vector.multi_reduction <add>, %25, %cst_23 [1] : vector<24x32xf32> to vector<24xf32>
    %27 = vector.shape_cast %26 : vector<24xf32> to vector<24x1xf32>
    %cst_24 = arith.constant 3.200000e+01 : f32
    %28 = vector.broadcast %cst_24 : f32 to vector<24x1xf32>
    %29 = arith.divf %27, %28 : vector<24x1xf32>
    %cst_25 = arith.constant 9.99999974E-6 : f32
    %30 = vector.broadcast %cst_25 : f32 to vector<24x1xf32>
    %31 = arith.addf %29, %30 : vector<24x1xf32>
    %32 = math.rsqrt %31 : vector<24x1xf32>
    %33 = vector.broadcast %32 : vector<24x1xf32> to vector<24x32xf32>
    %34 = arith.mulf %23, %33 : vector<24x32xf32>
    %c0_26 = arith.constant 0 : index
    %c0_27 = arith.constant 0 : index
    %c0_28 = arith.constant 0 : index
    %35 = vector.load %arg6[%c0_26, %c0_27, %c0_28] : memref<2x1x32xf32, #tpu.memory_space<vmem>>, vector<1x1x32xf32>
    %36 = vector.shape_cast %35 : vector<1x1x32xf32> to vector<1x32xf32>
    %37 = vector.broadcast %36 : vector<1x32xf32> to vector<24x32xf32>
    %38 = arith.mulf %34, %37 : vector<24x32xf32>
    %39 = arith.truncf %38 : vector<24x32xf32> to vector<24x32xbf16>
    %c0_29 = arith.constant 0 : index
    %c0_30 = arith.constant 0 : index
    %c0_31 = arith.constant 0 : index
    %40 = vector.load %arg7[%c0_29, %c0_30, %c0_31] : memref<2x32x96xbf16, #tpu.memory_space<vmem>>, vector<1x32x96xbf16>
    %41 = vector.shape_cast %40 : vector<1x32x96xbf16> to vector<32x96xbf16>
    %cst_32 = arith.constant dense<0.000000e+00> : vector<24x96xf32>
    %42 = tpu.matmul %39, %41, %cst_32 {dimension_numbers = #tpu.dot_dimension_numbers<[1], [0], [0], [1], [0, 0, 1, 1], [], []>} : vector<24x32xbf16>, vector<32x96xbf16>, vector<24x96xf32> -> vector<24x96xf32>
    %43 = vector.extract_strided_slice %42 {offsets = [0, 0], sizes = [12, 8], strides = [1, 1]} : vector<24x96xf32> to vector<12x8xf32>
    %44 = vector.extract_strided_slice %42 {offsets = [0, 32], sizes = [12, 8], strides = [1, 1]} : vector<24x96xf32> to vector<12x8xf32>
    %45 = vector.extract_strided_slice %42 {offsets = [0, 64], sizes = [12, 8], strides = [1, 1]} : vector<24x96xf32> to vector<12x8xf32>
    %46 = vector.extract_strided_slice %42 {offsets = [0, 8], sizes = [12, 8], strides = [1, 1]} : vector<24x96xf32> to vector<12x8xf32>
    %47 = vector.extract_strided_slice %42 {offsets = [0, 40], sizes = [12, 8], strides = [1, 1]} : vector<24x96xf32> to vector<12x8xf32>
    %48 = vector.extract_strided_slice %42 {offsets = [0, 72], sizes = [12, 8], strides = [1, 1]} : vector<24x96xf32> to vector<12x8xf32>
    %49 = vector.extract_strided_slice %42 {offsets = [0, 16], sizes = [12, 8], strides = [1, 1]} : vector<24x96xf32> to vector<12x8xf32>
    %50 = vector.extract_strided_slice %42 {offsets = [0, 48], sizes = [12, 8], strides = [1, 1]} : vector<24x96xf32> to vector<12x8xf32>
    %51 = vector.extract_strided_slice %42 {offsets = [0, 80], sizes = [12, 8], strides = [1, 1]} : vector<24x96xf32> to vector<12x8xf32>
    %52 = vector.extract_strided_slice %42 {offsets = [0, 24], sizes = [12, 8], strides = [1, 1]} : vector<24x96xf32> to vector<12x8xf32>
    %53 = vector.extract_strided_slice %42 {offsets = [0, 56], sizes = [12, 8], strides = [1, 1]} : vector<24x96xf32> to vector<12x8xf32>
    %54 = vector.extract_strided_slice %42 {offsets = [0, 88], sizes = [12, 8], strides = [1, 1]} : vector<24x96xf32> to vector<12x8xf32>
    %55 = vector.extract_strided_slice %42 {offsets = [12, 0], sizes = [12, 8], strides = [1, 1]} : vector<24x96xf32> to vector<12x8xf32>
    %56 = vector.extract_strided_slice %42 {offsets = [12, 32], sizes = [12, 8], strides = [1, 1]} : vector<24x96xf32> to vector<12x8xf32>
    %57 = vector.extract_strided_slice %42 {offsets = [12, 64], sizes = [12, 8], strides = [1, 1]} : vector<24x96xf32> to vector<12x8xf32>
    %58 = vector.extract_strided_slice %42 {offsets = [12, 8], sizes = [12, 8], strides = [1, 1]} : vector<24x96xf32> to vector<12x8xf32>
    %59 = vector.extract_strided_slice %42 {offsets = [12, 40], sizes = [12, 8], strides = [1, 1]} : vector<24x96xf32> to vector<12x8xf32>
    %60 = vector.extract_strided_slice %42 {offsets = [12, 72], sizes = [12, 8], strides = [1, 1]} : vector<24x96xf32> to vector<12x8xf32>
    %61 = vector.extract_strided_slice %42 {offsets = [12, 16], sizes = [12, 8], strides = [1, 1]} : vector<24x96xf32> to vector<12x8xf32>
    %62 = vector.extract_strided_slice %42 {offsets = [12, 48], sizes = [12, 8], strides = [1, 1]} : vector<24x96xf32> to vector<12x8xf32>
    %63 = vector.extract_strided_slice %42 {offsets = [12, 80], sizes = [12, 8], strides = [1, 1]} : vector<24x96xf32> to vector<12x8xf32>
    %64 = vector.extract_strided_slice %42 {offsets = [12, 24], sizes = [12, 8], strides = [1, 1]} : vector<24x96xf32> to vector<12x8xf32>
    %65 = vector.extract_strided_slice %42 {offsets = [12, 56], sizes = [12, 8], strides = [1, 1]} : vector<24x96xf32> to vector<12x8xf32>
    %66 = vector.extract_strided_slice %42 {offsets = [12, 88], sizes = [12, 8], strides = [1, 1]} : vector<24x96xf32> to vector<12x8xf32>
    %67 = tpu.concatenate %43, %46, %49, %52, %55, %58, %61, %64 in 0 : vector<12x8xf32>, vector<12x8xf32>, vector<12x8xf32>, vector<12x8xf32>, vector<12x8xf32>, vector<12x8xf32>, vector<12x8xf32>, vector<12x8xf32> -> vector<96x8xf32>
    %cst_33 = arith.constant 0.353553385 : f32
    %68 = vector.broadcast %cst_33 : f32 to vector<96x8xf32>
    %69 = arith.mulf %67, %68 : vector<96x8xf32>
    %70 = arith.truncf %69 : vector<96x8xf32> to vector<96x8xbf16>
    %71 = tpu.concatenate %44, %47, %50, %53, %56, %59, %62, %65 in 0 : vector<12x8xf32>, vector<12x8xf32>, vector<12x8xf32>, vector<12x8xf32>, vector<12x8xf32>, vector<12x8xf32>, vector<12x8xf32>, vector<12x8xf32> -> vector<96x8xf32>
    %72 = arith.truncf %71 : vector<96x8xf32> to vector<96x8xbf16>
    %73 = tpu.concatenate %45, %48, %51, %54, %57, %60, %63, %66 in 0 : vector<12x8xf32>, vector<12x8xf32>, vector<12x8xf32>, vector<12x8xf32>, vector<12x8xf32>, vector<12x8xf32>, vector<12x8xf32>, vector<12x8xf32> -> vector<96x8xf32>
    %74 = arith.truncf %73 : vector<96x8xf32> to vector<96x8xbf16>
    %cst_34 = arith.constant dense<0.000000e+00> : vector<96x96xf32>
    %75 = tpu.matmul %70, %72, %cst_34 {dimension_numbers = #tpu.dot_dimension_numbers<[1], [1], [0], [0], [0, 0, 1, 0], [], []>} : vector<96x8xbf16>, vector<96x8xbf16>, vector<96x96xf32> -> vector<96x96xf32>
    %76 = arith.addf %75, %24 : vector<96x96xf32>
    %cst_35 = arith.constant dense<0xFF800000> : vector<96xf32>
    %77 = vector.multi_reduction <maximumf>, %76, %cst_35 [1] : vector<96x96xf32> to vector<96xf32>
    %78 = vector.shape_cast %77 : vector<96xf32> to vector<96x1xf32>
    %79 = vector.broadcast %78 : vector<96x1xf32> to vector<96x96xf32>
    %80 = arith.subf %76, %79 : vector<96x96xf32>
    %81 = math.exp %80 : vector<96x96xf32>
    %cst_36 = arith.constant dense<0.000000e+00> : vector<96xf32>
    %82 = vector.multi_reduction <add>, %81, %cst_36 [1] : vector<96x96xf32> to vector<96xf32>
    %83 = vector.shape_cast %82 : vector<96xf32> to vector<96x1xf32>
    %84 = tpu.reciprocal %83 {approx = true} : vector<96x1xf32> -> vector<96x1xf32>
    %85 = vector.broadcast %84 : vector<96x1xf32> to vector<96x96xf32>
    %86 = arith.mulf %81, %85 : vector<96x96xf32>
    %87 = arith.truncf %86 : vector<96x96xf32> to vector<96x96xbf16>
    %cst_37 = arith.constant dense<0.000000e+00> : vector<96x8xf32>
    %88 = tpu.matmul %87, %74, %cst_37 {dimension_numbers = #tpu.dot_dimension_numbers<[1], [0], [0], [1], [0, 0, 1, 1], [], []>} : vector<96x96xbf16>, vector<96x8xbf16>, vector<96x8xf32> -> vector<96x8xf32>
    %89 = vector.extract_strided_slice %88 {offsets = [0, 0], sizes = [12, 8], strides = [1, 1]} : vector<96x8xf32> to vector<12x8xf32>
    %90 = vector.extract_strided_slice %88 {offsets = [12, 0], sizes = [12, 8], strides = [1, 1]} : vector<96x8xf32> to vector<12x8xf32>
    %91 = vector.extract_strided_slice %88 {offsets = [24, 0], sizes = [12, 8], strides = [1, 1]} : vector<96x8xf32> to vector<12x8xf32>
    %92 = vector.extract_strided_slice %88 {offsets = [36, 0], sizes = [12, 8], strides = [1, 1]} : vector<96x8xf32> to vector<12x8xf32>
    %93 = tpu.concatenate %89, %90, %91, %92 in 1 : vector<12x8xf32>, vector<12x8xf32>, vector<12x8xf32>, vector<12x8xf32> -> vector<12x32xf32>
    %94 = vector.extract_strided_slice %88 {offsets = [48, 0], sizes = [12, 8], strides = [1, 1]} : vector<96x8xf32> to vector<12x8xf32>
    %95 = vector.extract_strided_slice %88 {offsets = [60, 0], sizes = [12, 8], strides = [1, 1]} : vector<96x8xf32> to vector<12x8xf32>
    %96 = vector.extract_strided_slice %88 {offsets = [72, 0], sizes = [12, 8], strides = [1, 1]} : vector<96x8xf32> to vector<12x8xf32>
    %97 = vector.extract_strided_slice %88 {offsets = [84, 0], sizes = [12, 8], strides = [1, 1]} : vector<96x8xf32> to vector<12x8xf32>
    %98 = tpu.concatenate %94, %95, %96, %97 in 1 : vector<12x8xf32>, vector<12x8xf32>, vector<12x8xf32>, vector<12x8xf32> -> vector<12x32xf32>
    %99 = tpu.concatenate %93, %98 in 0 : vector<12x32xf32>, vector<12x32xf32> -> vector<24x32xf32>
    %100 = arith.truncf %99 : vector<24x32xf32> to vector<24x32xbf16>
    %c0_38 = arith.constant 0 : index
    %c0_39 = arith.constant 0 : index
    %c0_40 = arith.constant 0 : index
    %101 = vector.load %arg8[%c0_38, %c0_39, %c0_40] : memref<2x32x32xbf16, #tpu.memory_space<vmem>>, vector<1x32x32xbf16>
    %102 = vector.shape_cast %101 : vector<1x32x32xbf16> to vector<32x32xbf16>
    %cst_41 = arith.constant dense<0.000000e+00> : vector<24x32xf32>
    %103 = tpu.matmul %100, %102, %cst_41 {dimension_numbers = #tpu.dot_dimension_numbers<[1], [0], [0], [1], [0, 0, 1, 1], [], []>} : vector<24x32xbf16>, vector<32x32xbf16>, vector<24x32xf32> -> vector<24x32xf32>
    %104 = arith.addf %23, %103 : vector<24x32xf32>
    %105 = arith.mulf %104, %104 : vector<24x32xf32>
    %cst_42 = arith.constant dense<0.000000e+00> : vector<24xf32>
    %106 = vector.multi_reduction <add>, %105, %cst_42 [1] : vector<24x32xf32> to vector<24xf32>
    %107 = vector.shape_cast %106 : vector<24xf32> to vector<24x1xf32>
    %cst_43 = arith.constant 3.200000e+01 : f32
    %108 = vector.broadcast %cst_43 : f32 to vector<24x1xf32>
    %109 = arith.divf %107, %108 : vector<24x1xf32>
    %cst_44 = arith.constant 9.99999974E-6 : f32
    %110 = vector.broadcast %cst_44 : f32 to vector<24x1xf32>
    %111 = arith.addf %109, %110 : vector<24x1xf32>
    %112 = math.rsqrt %111 : vector<24x1xf32>
    %113 = vector.broadcast %112 : vector<24x1xf32> to vector<24x32xf32>
    %114 = arith.mulf %104, %113 : vector<24x32xf32>
    %c0_45 = arith.constant 0 : index
    %c0_46 = arith.constant 0 : index
    %c0_47 = arith.constant 0 : index
    %115 = vector.load %arg9[%c0_45, %c0_46, %c0_47] : memref<2x1x32xf32, #tpu.memory_space<vmem>>, vector<1x1x32xf32>
    %116 = vector.shape_cast %115 : vector<1x1x32xf32> to vector<1x32xf32>
    %117 = vector.broadcast %116 : vector<1x32xf32> to vector<24x32xf32>
    %118 = arith.mulf %114, %117 : vector<24x32xf32>
    %119 = arith.truncf %118 : vector<24x32xf32> to vector<24x32xbf16>
    %c0_48 = arith.constant 0 : index
    %c0_49 = arith.constant 0 : index
    %c0_50 = arith.constant 0 : index
    %120 = vector.load %arg10[%c0_48, %c0_49, %c0_50] : memref<2x32x128xbf16, #tpu.memory_space<vmem>>, vector<1x32x128xbf16>
    %121 = vector.shape_cast %120 : vector<1x32x128xbf16> to vector<32x128xbf16>
    %cst_51 = arith.constant dense<0.000000e+00> : vector<24x128xf32>
    %122 = tpu.matmul %119, %121, %cst_51 {dimension_numbers = #tpu.dot_dimension_numbers<[1], [0], [0], [1], [0, 0, 1, 1], [], []>} : vector<24x32xbf16>, vector<32x128xbf16>, vector<24x128xf32> -> vector<24x128xf32>
    %123 = vector.extract_strided_slice %122 {offsets = [0, 0], sizes = [24, 64], strides = [1, 1]} : vector<24x128xf32> to vector<24x64xf32>
    %124 = arith.negf %123 : vector<24x64xf32>
    %125 = math.exp %124 : vector<24x64xf32>
    %cst_52 = arith.constant 1.000000e+00 : f32
    %126 = vector.broadcast %cst_52 : f32 to vector<24x64xf32>
    %127 = arith.addf %126, %125 : vector<24x64xf32>
    %128 = arith.divf %126, %127 : vector<24x64xf32>
    %129 = arith.mulf %123, %128 : vector<24x64xf32>
    %130 = vector.extract_strided_slice %122 {offsets = [0, 64], sizes = [24, 64], strides = [1, 1]} : vector<24x128xf32> to vector<24x64xf32>
    %131 = arith.mulf %129, %130 : vector<24x64xf32>
    %132 = arith.truncf %131 : vector<24x64xf32> to vector<24x64xbf16>
    %c0_53 = arith.constant 0 : index
    %c0_54 = arith.constant 0 : index
    %c0_55 = arith.constant 0 : index
    %133 = vector.load %arg11[%c0_53, %c0_54, %c0_55] : memref<2x64x32xbf16, #tpu.memory_space<vmem>>, vector<1x64x32xbf16>
    %134 = vector.shape_cast %133 : vector<1x64x32xbf16> to vector<64x32xbf16>
    %cst_56 = arith.constant dense<0.000000e+00> : vector<24x32xf32>
    %135 = tpu.matmul %132, %134, %cst_56 {dimension_numbers = #tpu.dot_dimension_numbers<[1], [0], [0], [1], [0, 0, 1, 1], [], []>} : vector<24x64xbf16>, vector<64x32xbf16>, vector<24x32xf32> -> vector<24x32xf32>
    %136 = arith.addf %104, %135 : vector<24x32xf32>
    %137 = arith.mulf %136, %136 : vector<24x32xf32>
    %cst_57 = arith.constant dense<0.000000e+00> : vector<24xf32>
    %138 = vector.multi_reduction <add>, %137, %cst_57 [1] : vector<24x32xf32> to vector<24xf32>
    %139 = vector.shape_cast %138 : vector<24xf32> to vector<24x1xf32>
    %cst_58 = arith.constant 3.200000e+01 : f32
    %140 = vector.broadcast %cst_58 : f32 to vector<24x1xf32>
    %141 = arith.divf %139, %140 : vector<24x1xf32>
    %cst_59 = arith.constant 9.99999974E-6 : f32
    %142 = vector.broadcast %cst_59 : f32 to vector<24x1xf32>
    %143 = arith.addf %141, %142 : vector<24x1xf32>
    %144 = math.rsqrt %143 : vector<24x1xf32>
    %145 = vector.broadcast %144 : vector<24x1xf32> to vector<24x32xf32>
    %146 = arith.mulf %136, %145 : vector<24x32xf32>
    %c1_60 = arith.constant 1 : index
    %c0_61 = arith.constant 0 : index
    %c0_62 = arith.constant 0 : index
    %147 = vector.load %arg6[%c1_60, %c0_61, %c0_62] : memref<2x1x32xf32, #tpu.memory_space<vmem>>, vector<1x1x32xf32>
    %148 = vector.shape_cast %147 : vector<1x1x32xf32> to vector<1x32xf32>
    %149 = vector.broadcast %148 : vector<1x32xf32> to vector<24x32xf32>
    %150 = arith.mulf %146, %149 : vector<24x32xf32>
    %151 = arith.truncf %150 : vector<24x32xf32> to vector<24x32xbf16>
    %c1_63 = arith.constant 1 : index
    %c0_64 = arith.constant 0 : index
    %c0_65 = arith.constant 0 : index
    %152 = vector.load %arg7[%c1_63, %c0_64, %c0_65] : memref<2x32x96xbf16, #tpu.memory_space<vmem>>, vector<1x32x96xbf16>
    %153 = vector.shape_cast %152 : vector<1x32x96xbf16> to vector<32x96xbf16>
    %cst_66 = arith.constant dense<0.000000e+00> : vector<24x96xf32>
    %154 = tpu.matmul %151, %153, %cst_66 {dimension_numbers = #tpu.dot_dimension_numbers<[1], [0], [0], [1], [0, 0, 1, 1], [], []>} : vector<24x32xbf16>, vector<32x96xbf16>, vector<24x96xf32> -> vector<24x96xf32>
    %155 = vector.extract_strided_slice %154 {offsets = [0, 0], sizes = [12, 8], strides = [1, 1]} : vector<24x96xf32> to vector<12x8xf32>
    %156 = vector.extract_strided_slice %154 {offsets = [0, 32], sizes = [12, 8], strides = [1, 1]} : vector<24x96xf32> to vector<12x8xf32>
    %157 = vector.extract_strided_slice %154 {offsets = [0, 64], sizes = [12, 8], strides = [1, 1]} : vector<24x96xf32> to vector<12x8xf32>
    %158 = vector.extract_strided_slice %154 {offsets = [0, 8], sizes = [12, 8], strides = [1, 1]} : vector<24x96xf32> to vector<12x8xf32>
    %159 = vector.extract_strided_slice %154 {offsets = [0, 40], sizes = [12, 8], strides = [1, 1]} : vector<24x96xf32> to vector<12x8xf32>
    %160 = vector.extract_strided_slice %154 {offsets = [0, 72], sizes = [12, 8], strides = [1, 1]} : vector<24x96xf32> to vector<12x8xf32>
    %161 = vector.extract_strided_slice %154 {offsets = [0, 16], sizes = [12, 8], strides = [1, 1]} : vector<24x96xf32> to vector<12x8xf32>
    %162 = vector.extract_strided_slice %154 {offsets = [0, 48], sizes = [12, 8], strides = [1, 1]} : vector<24x96xf32> to vector<12x8xf32>
    %163 = vector.extract_strided_slice %154 {offsets = [0, 80], sizes = [12, 8], strides = [1, 1]} : vector<24x96xf32> to vector<12x8xf32>
    %164 = vector.extract_strided_slice %154 {offsets = [0, 24], sizes = [12, 8], strides = [1, 1]} : vector<24x96xf32> to vector<12x8xf32>
    %165 = vector.extract_strided_slice %154 {offsets = [0, 56], sizes = [12, 8], strides = [1, 1]} : vector<24x96xf32> to vector<12x8xf32>
    %166 = vector.extract_strided_slice %154 {offsets = [0, 88], sizes = [12, 8], strides = [1, 1]} : vector<24x96xf32> to vector<12x8xf32>
    %167 = vector.extract_strided_slice %154 {offsets = [12, 0], sizes = [12, 8], strides = [1, 1]} : vector<24x96xf32> to vector<12x8xf32>
    %168 = vector.extract_strided_slice %154 {offsets = [12, 32], sizes = [12, 8], strides = [1, 1]} : vector<24x96xf32> to vector<12x8xf32>
    %169 = vector.extract_strided_slice %154 {offsets = [12, 64], sizes = [12, 8], strides = [1, 1]} : vector<24x96xf32> to vector<12x8xf32>
    %170 = vector.extract_strided_slice %154 {offsets = [12, 8], sizes = [12, 8], strides = [1, 1]} : vector<24x96xf32> to vector<12x8xf32>
    %171 = vector.extract_strided_slice %154 {offsets = [12, 40], sizes = [12, 8], strides = [1, 1]} : vector<24x96xf32> to vector<12x8xf32>
    %172 = vector.extract_strided_slice %154 {offsets = [12, 72], sizes = [12, 8], strides = [1, 1]} : vector<24x96xf32> to vector<12x8xf32>
    %173 = vector.extract_strided_slice %154 {offsets = [12, 16], sizes = [12, 8], strides = [1, 1]} : vector<24x96xf32> to vector<12x8xf32>
    %174 = vector.extract_strided_slice %154 {offsets = [12, 48], sizes = [12, 8], strides = [1, 1]} : vector<24x96xf32> to vector<12x8xf32>
    %175 = vector.extract_strided_slice %154 {offsets = [12, 80], sizes = [12, 8], strides = [1, 1]} : vector<24x96xf32> to vector<12x8xf32>
    %176 = vector.extract_strided_slice %154 {offsets = [12, 24], sizes = [12, 8], strides = [1, 1]} : vector<24x96xf32> to vector<12x8xf32>
    %177 = vector.extract_strided_slice %154 {offsets = [12, 56], sizes = [12, 8], strides = [1, 1]} : vector<24x96xf32> to vector<12x8xf32>
    %178 = vector.extract_strided_slice %154 {offsets = [12, 88], sizes = [12, 8], strides = [1, 1]} : vector<24x96xf32> to vector<12x8xf32>
    %179 = tpu.concatenate %155, %158, %161, %164, %167, %170, %173, %176 in 0 : vector<12x8xf32>, vector<12x8xf32>, vector<12x8xf32>, vector<12x8xf32>, vector<12x8xf32>, vector<12x8xf32>, vector<12x8xf32>, vector<12x8xf32> -> vector<96x8xf32>
    %cst_67 = arith.constant 0.353553385 : f32
    %180 = vector.broadcast %cst_67 : f32 to vector<96x8xf32>
    %181 = arith.mulf %179, %180 : vector<96x8xf32>
    %182 = arith.truncf %181 : vector<96x8xf32> to vector<96x8xbf16>
    %183 = tpu.concatenate %156, %159, %162, %165, %168, %171, %174, %177 in 0 : vector<12x8xf32>, vector<12x8xf32>, vector<12x8xf32>, vector<12x8xf32>, vector<12x8xf32>, vector<12x8xf32>, vector<12x8xf32>, vector<12x8xf32> -> vector<96x8xf32>
    %184 = arith.truncf %183 : vector<96x8xf32> to vector<96x8xbf16>
    %185 = tpu.concatenate %157, %160, %163, %166, %169, %172, %175, %178 in 0 : vector<12x8xf32>, vector<12x8xf32>, vector<12x8xf32>, vector<12x8xf32>, vector<12x8xf32>, vector<12x8xf32>, vector<12x8xf32>, vector<12x8xf32> -> vector<96x8xf32>
    %186 = arith.truncf %185 : vector<96x8xf32> to vector<96x8xbf16>
    %cst_68 = arith.constant dense<0.000000e+00> : vector<96x96xf32>
    %187 = tpu.matmul %182, %184, %cst_68 {dimension_numbers = #tpu.dot_dimension_numbers<[1], [1], [0], [0], [0, 0, 1, 0], [], []>} : vector<96x8xbf16>, vector<96x8xbf16>, vector<96x96xf32> -> vector<96x96xf32>
    %188 = arith.addf %187, %24 : vector<96x96xf32>
    %cst_69 = arith.constant dense<0xFF800000> : vector<96xf32>
    %189 = vector.multi_reduction <maximumf>, %188, %cst_69 [1] : vector<96x96xf32> to vector<96xf32>
    %190 = vector.shape_cast %189 : vector<96xf32> to vector<96x1xf32>
    %191 = vector.broadcast %190 : vector<96x1xf32> to vector<96x96xf32>
    %192 = arith.subf %188, %191 : vector<96x96xf32>
    %193 = math.exp %192 : vector<96x96xf32>
    %cst_70 = arith.constant dense<0.000000e+00> : vector<96xf32>
    %194 = vector.multi_reduction <add>, %193, %cst_70 [1] : vector<96x96xf32> to vector<96xf32>
    %195 = vector.shape_cast %194 : vector<96xf32> to vector<96x1xf32>
    %196 = tpu.reciprocal %195 {approx = true} : vector<96x1xf32> -> vector<96x1xf32>
    %197 = vector.broadcast %196 : vector<96x1xf32> to vector<96x96xf32>
    %198 = arith.mulf %193, %197 : vector<96x96xf32>
    %199 = arith.truncf %198 : vector<96x96xf32> to vector<96x96xbf16>
    %cst_71 = arith.constant dense<0.000000e+00> : vector<96x8xf32>
    %200 = tpu.matmul %199, %186, %cst_71 {dimension_numbers = #tpu.dot_dimension_numbers<[1], [0], [0], [1], [0, 0, 1, 1], [], []>} : vector<96x96xbf16>, vector<96x8xbf16>, vector<96x8xf32> -> vector<96x8xf32>
    %201 = vector.extract_strided_slice %200 {offsets = [0, 0], sizes = [12, 8], strides = [1, 1]} : vector<96x8xf32> to vector<12x8xf32>
    %202 = vector.extract_strided_slice %200 {offsets = [12, 0], sizes = [12, 8], strides = [1, 1]} : vector<96x8xf32> to vector<12x8xf32>
    %203 = vector.extract_strided_slice %200 {offsets = [24, 0], sizes = [12, 8], strides = [1, 1]} : vector<96x8xf32> to vector<12x8xf32>
    %204 = vector.extract_strided_slice %200 {offsets = [36, 0], sizes = [12, 8], strides = [1, 1]} : vector<96x8xf32> to vector<12x8xf32>
    %205 = tpu.concatenate %201, %202, %203, %204 in 1 : vector<12x8xf32>, vector<12x8xf32>, vector<12x8xf32>, vector<12x8xf32> -> vector<12x32xf32>
    %206 = vector.extract_strided_slice %200 {offsets = [48, 0], sizes = [12, 8], strides = [1, 1]} : vector<96x8xf32> to vector<12x8xf32>
    %207 = vector.extract_strided_slice %200 {offsets = [60, 0], sizes = [12, 8], strides = [1, 1]} : vector<96x8xf32> to vector<12x8xf32>
    %208 = vector.extract_strided_slice %200 {offsets = [72, 0], sizes = [12, 8], strides = [1, 1]} : vector<96x8xf32> to vector<12x8xf32>
    %209 = vector.extract_strided_slice %200 {offsets = [84, 0], sizes = [12, 8], strides = [1, 1]} : vector<96x8xf32> to vector<12x8xf32>
    %210 = tpu.concatenate %206, %207, %208, %209 in 1 : vector<12x8xf32>, vector<12x8xf32>, vector<12x8xf32>, vector<12x8xf32> -> vector<12x32xf32>
    %211 = tpu.concatenate %205, %210 in 0 : vector<12x32xf32>, vector<12x32xf32> -> vector<24x32xf32>
    %212 = arith.truncf %211 : vector<24x32xf32> to vector<24x32xbf16>
    %c1_72 = arith.constant 1 : index
    %c0_73 = arith.constant 0 : index
    %c0_74 = arith.constant 0 : index
    %213 = vector.load %arg8[%c1_72, %c0_73, %c0_74] : memref<2x32x32xbf16, #tpu.memory_space<vmem>>, vector<1x32x32xbf16>
    %214 = vector.shape_cast %213 : vector<1x32x32xbf16> to vector<32x32xbf16>
    %cst_75 = arith.constant dense<0.000000e+00> : vector<24x32xf32>
    %215 = tpu.matmul %212, %214, %cst_75 {dimension_numbers = #tpu.dot_dimension_numbers<[1], [0], [0], [1], [0, 0, 1, 1], [], []>} : vector<24x32xbf16>, vector<32x32xbf16>, vector<24x32xf32> -> vector<24x32xf32>
    %216 = arith.addf %136, %215 : vector<24x32xf32>
    %217 = arith.mulf %216, %216 : vector<24x32xf32>
    %cst_76 = arith.constant dense<0.000000e+00> : vector<24xf32>
    %218 = vector.multi_reduction <add>, %217, %cst_76 [1] : vector<24x32xf32> to vector<24xf32>
    %219 = vector.shape_cast %218 : vector<24xf32> to vector<24x1xf32>
    %cst_77 = arith.constant 3.200000e+01 : f32
    %220 = vector.broadcast %cst_77 : f32 to vector<24x1xf32>
    %221 = arith.divf %219, %220 : vector<24x1xf32>
    %cst_78 = arith.constant 9.99999974E-6 : f32
    %222 = vector.broadcast %cst_78 : f32 to vector<24x1xf32>
    %223 = arith.addf %221, %222 : vector<24x1xf32>
    %224 = math.rsqrt %223 : vector<24x1xf32>
    %225 = vector.broadcast %224 : vector<24x1xf32> to vector<24x32xf32>
    %226 = arith.mulf %216, %225 : vector<24x32xf32>
    %c1_79 = arith.constant 1 : index
    %c0_80 = arith.constant 0 : index
    %c0_81 = arith.constant 0 : index
    %227 = vector.load %arg9[%c1_79, %c0_80, %c0_81] : memref<2x1x32xf32, #tpu.memory_space<vmem>>, vector<1x1x32xf32>
    %228 = vector.shape_cast %227 : vector<1x1x32xf32> to vector<1x32xf32>
    %229 = vector.broadcast %228 : vector<1x32xf32> to vector<24x32xf32>
    %230 = arith.mulf %226, %229 : vector<24x32xf32>
    %231 = arith.truncf %230 : vector<24x32xf32> to vector<24x32xbf16>
    %c1_82 = arith.constant 1 : index
    %c0_83 = arith.constant 0 : index
    %c0_84 = arith.constant 0 : index
    %232 = vector.load %arg10[%c1_82, %c0_83, %c0_84] : memref<2x32x128xbf16, #tpu.memory_space<vmem>>, vector<1x32x128xbf16>
    %233 = vector.shape_cast %232 : vector<1x32x128xbf16> to vector<32x128xbf16>
    %cst_85 = arith.constant dense<0.000000e+00> : vector<24x128xf32>
    %234 = tpu.matmul %231, %233, %cst_85 {dimension_numbers = #tpu.dot_dimension_numbers<[1], [0], [0], [1], [0, 0, 1, 1], [], []>} : vector<24x32xbf16>, vector<32x128xbf16>, vector<24x128xf32> -> vector<24x128xf32>
    %235 = vector.extract_strided_slice %234 {offsets = [0, 0], sizes = [24, 64], strides = [1, 1]} : vector<24x128xf32> to vector<24x64xf32>
    %236 = arith.negf %235 : vector<24x64xf32>
    %237 = math.exp %236 : vector<24x64xf32>
    %cst_86 = arith.constant 1.000000e+00 : f32
    %238 = vector.broadcast %cst_86 : f32 to vector<24x64xf32>
    %239 = arith.addf %238, %237 : vector<24x64xf32>
    %240 = arith.divf %238, %239 : vector<24x64xf32>
    %241 = arith.mulf %235, %240 : vector<24x64xf32>
    %242 = vector.extract_strided_slice %234 {offsets = [0, 64], sizes = [24, 64], strides = [1, 1]} : vector<24x128xf32> to vector<24x64xf32>
    %243 = arith.mulf %241, %242 : vector<24x64xf32>
    %244 = arith.truncf %243 : vector<24x64xf32> to vector<24x64xbf16>
    %c1_87 = arith.constant 1 : index
    %c0_88 = arith.constant 0 : index
    %c0_89 = arith.constant 0 : index
    %245 = vector.load %arg11[%c1_87, %c0_88, %c0_89] : memref<2x64x32xbf16, #tpu.memory_space<vmem>>, vector<1x64x32xbf16>
    %246 = vector.shape_cast %245 : vector<1x64x32xbf16> to vector<64x32xbf16>
    %cst_90 = arith.constant dense<0.000000e+00> : vector<24x32xf32>
    %247 = tpu.matmul %244, %246, %cst_90 {dimension_numbers = #tpu.dot_dimension_numbers<[1], [0], [0], [1], [0, 0, 1, 1], [], []>} : vector<24x64xbf16>, vector<64x32xbf16>, vector<24x32xf32> -> vector<24x32xf32>
    %248 = arith.addf %216, %247 : vector<24x32xf32>
    %249 = vector.extract_strided_slice %248 {offsets = [0, 0], sizes = [8, 32], strides = [1, 1]} : vector<24x32xf32> to vector<8x32xf32>
    %250 = vector.extract_strided_slice %248 {offsets = [12, 0], sizes = [8, 32], strides = [1, 1]} : vector<24x32xf32> to vector<8x32xf32>
    %251 = tpu.concatenate %249, %250 in 0 : vector<8x32xf32>, vector<8x32xf32> -> vector<16x32xf32>
    %252 = arith.mulf %251, %251 : vector<16x32xf32>
    %cst_91 = arith.constant dense<0.000000e+00> : vector<16xf32>
    %253 = vector.multi_reduction <add>, %252, %cst_91 [1] : vector<16x32xf32> to vector<16xf32>
    %254 = vector.shape_cast %253 : vector<16xf32> to vector<16x1xf32>
    %cst_92 = arith.constant 3.200000e+01 : f32
    %255 = vector.broadcast %cst_92 : f32 to vector<16x1xf32>
    %256 = arith.divf %254, %255 : vector<16x1xf32>
    %cst_93 = arith.constant 9.99999974E-6 : f32
    %257 = vector.broadcast %cst_93 : f32 to vector<16x1xf32>
    %258 = arith.addf %256, %257 : vector<16x1xf32>
    %259 = math.rsqrt %258 : vector<16x1xf32>
    %260 = vector.broadcast %259 : vector<16x1xf32> to vector<16x32xf32>
    %261 = arith.mulf %251, %260 : vector<16x32xf32>
    %c0_94 = arith.constant 0 : index
    %c0_95 = arith.constant 0 : index
    %262 = vector.load %arg12[%c0_94, %c0_95] : memref<1x32xf32, #tpu.memory_space<vmem>>, vector<1x32xf32>
    %263 = vector.broadcast %262 : vector<1x32xf32> to vector<16x32xf32>
    %264 = arith.mulf %261, %263 : vector<16x32xf32>
    %265 = arith.truncf %264 : vector<16x32xf32> to vector<16x32xbf16>
    %c0_96 = arith.constant 0 : index
    %c0_97 = arith.constant 0 : index
    %266 = vector.load %arg13[%c0_96, %c0_97] : memref<32x16xbf16, #tpu.memory_space<vmem>>, vector<32x16xbf16>
    %cst_98 = arith.constant dense<0.000000e+00> : vector<16x16xf32>
    %267 = tpu.matmul %265, %266, %cst_98 {dimension_numbers = #tpu.dot_dimension_numbers<[1], [0], [0], [1], [0, 0, 1, 1], [], []>} : vector<16x32xbf16>, vector<32x16xbf16>, vector<16x16xf32> -> vector<16x16xf32>
    %c0_99 = arith.constant 0 : index
    %c0_100 = arith.constant 0 : index
    %268 = vector.load %arg14[%c0_99, %c0_100] : memref<1x16xf32, #tpu.memory_space<vmem>>, vector<1x16xf32>
    %269 = vector.broadcast %268 : vector<1x16xf32> to vector<16x16xf32>
    %270 = arith.addf %267, %269 : vector<16x16xf32>
    %271 = vector.extract_strided_slice %270 {offsets = [0, 0], sizes = [8, 16], strides = [1, 1]} : vector<16x16xf32> to vector<8x16xf32>
    %c0_101 = arith.constant 0 : index
    %c0_102 = arith.constant 0 : index
    %c0_103 = arith.constant 0 : index
    %272 = vector.load %arg16[%c0_101, %c0_102, %c0_103] : memref<2x8x16xf32, #tpu.memory_space<vmem>>, vector<1x8x16xf32>
    %273 = vector.shape_cast %272 : vector<1x8x16xf32> to vector<8x16xf32>
    %274 = vector.shape_cast %271 : vector<8x16xf32> to vector<1x8x16xf32>
    tpu.vector_store %arg16[%c0_101, %c0_102, %c0_103], %274 {strides = array<i32>} : memref<2x8x16xf32, #tpu.memory_space<vmem>>, vector<1x8x16xf32>,
    %c0_104 = arith.constant 0 : index
    %c0_105 = arith.constant 0 : index
    %c0_106 = arith.constant 0 : index
    %275 = vector.load %arg15[%c0_104, %c0_105, %c0_106] : memref<2x8x16xf32, #tpu.memory_space<vmem>>, vector<1x8x16xf32>
    %276 = vector.shape_cast %275 : vector<1x8x16xf32> to vector<8x16xf32>
    %cst_107 = arith.constant 0.000000e+00 : f32
    %277 = vector.broadcast %cst_107 : f32 to vector<8x16xf32>
    %278 = arith.maximumf %271, %277 : vector<8x16xf32>
    %279 = arith.mulf %271, %276 : vector<8x16xf32>
    %280 = arith.subf %278, %279 : vector<8x16xf32>
    %281 = math.absf %271 : vector<8x16xf32>
    %cst_108 = arith.constant 0.000000e+00 : f32
    %282 = vector.broadcast %cst_108 : f32 to vector<8x16xf32>
    %283 = arith.subf %282, %281 : vector<8x16xf32>
    %284 = math.exp %283 : vector<8x16xf32>
    %285 = math.log1p %284 : vector<8x16xf32>
    %286 = arith.addf %280, %285 : vector<8x16xf32>
    %c0_109 = arith.constant 0 : index
    %c0_110 = arith.constant 0 : index
    %c0_111 = arith.constant 0 : index
    %287 = vector.load %arg17[%c0_109, %c0_110, %c0_111] : memref<2x8x16xf32, #tpu.memory_space<vmem>>, vector<1x8x16xf32>
    %288 = vector.shape_cast %287 : vector<1x8x16xf32> to vector<8x16xf32>
    %289 = vector.shape_cast %286 : vector<8x16xf32> to vector<1x8x16xf32>
    tpu.vector_store %arg17[%c0_109, %c0_110, %c0_111], %289 {strides = array<i32>} : memref<2x8x16xf32, #tpu.memory_space<vmem>>, vector<1x8x16xf32>,
    %290 = vector.extract_strided_slice %270 {offsets = [8, 0], sizes = [8, 16], strides = [1, 1]} : vector<16x16xf32> to vector<8x16xf32>
    %c1_112 = arith.constant 1 : index
    %c0_113 = arith.constant 0 : index
    %c0_114 = arith.constant 0 : index
    %291 = vector.load %arg16[%c1_112, %c0_113, %c0_114] : memref<2x8x16xf32, #tpu.memory_space<vmem>>, vector<1x8x16xf32>
    %292 = vector.shape_cast %291 : vector<1x8x16xf32> to vector<8x16xf32>
    %293 = vector.shape_cast %290 : vector<8x16xf32> to vector<1x8x16xf32>
    tpu.vector_store %arg16[%c1_112, %c0_113, %c0_114], %293 {strides = array<i32>} : memref<2x8x16xf32, #tpu.memory_space<vmem>>, vector<1x8x16xf32>,
    %c1_115 = arith.constant 1 : index
    %c0_116 = arith.constant 0 : index
    %c0_117 = arith.constant 0 : index
    %294 = vector.load %arg15[%c1_115, %c0_116, %c0_117] : memref<2x8x16xf32, #tpu.memory_space<vmem>>, vector<1x8x16xf32>
    %295 = vector.shape_cast %294 : vector<1x8x16xf32> to vector<8x16xf32>
    %cst_118 = arith.constant 0.000000e+00 : f32
    %296 = vector.broadcast %cst_118 : f32 to vector<8x16xf32>
    %297 = arith.maximumf %290, %296 : vector<8x16xf32>
    %298 = arith.mulf %290, %295 : vector<8x16xf32>
    %299 = arith.subf %297, %298 : vector<8x16xf32>
    %300 = math.absf %290 : vector<8x16xf32>
    %cst_119 = arith.constant 0.000000e+00 : f32
    %301 = vector.broadcast %cst_119 : f32 to vector<8x16xf32>
    %302 = arith.subf %301, %300 : vector<8x16xf32>
    %303 = math.exp %302 : vector<8x16xf32>
    %304 = math.log1p %303 : vector<8x16xf32>
    %305 = arith.addf %299, %304 : vector<8x16xf32>
    %c1_120 = arith.constant 1 : index
    %c0_121 = arith.constant 0 : index
    %c0_122 = arith.constant 0 : index
    %306 = vector.load %arg17[%c1_120, %c0_121, %c0_122] : memref<2x8x16xf32, #tpu.memory_space<vmem>>, vector<1x8x16xf32>
    %307 = vector.shape_cast %306 : vector<1x8x16xf32> to vector<8x16xf32>
    %308 = vector.shape_cast %305 : vector<8x16xf32> to vector<1x8x16xf32>
    tpu.vector_store %arg17[%c1_120, %c0_121, %c0_122], %308 {strides = array<i32>} : memref<2x8x16xf32, #tpu.memory_space<vmem>>, vector<1x8x16xf32>,
    return
  }
}

</mosaic_0001>

<bundles_post_ra>
// kernel: transformer_bin_forward.1
= control target key start
LH: loop header
LB: loop body
LE: loop exit
PB: predicated region body
PF: predicated region fallthrough
CT: control target
= control target key end

     0   :  { %s3839_s0 = inlined_call_operand.vmem [shape: f32[2,4,32], index: 0, kind: input, shape index: {}]   ;;  %s3840_s1 = inlined_call_operand.vmem [shape: bf16[2,8,16], index: 1, kind: input, shape index: {}]   ;;  %s3841_s2 = inlined_call_operand.vmem [shape: bf16[16,32], index: 2, kind: input, shape index: {}]   ;;  %s3842_s3 = inlined_call_operand.vmem [shape: f32[1,32], index: 3, kind: input, shape index: {}]   ;;  %s3843_s4 = inlined_call_operand.vmem [shape: f32[12,32], index: 4, kind: input, shape index: {}]   ;;  %s3844_s5 = inlined_call_operand.vmem [shape: f32[96,96], index: 5, kind: input, shape index: {}]   ;;  %s3845_s6 = inlined_call_operand.vmem [shape: f32[2,1,32], index: 6, kind: input, shape index: {}]   ;;  %s3846_s7 = inlined_call_operand.vmem [shape: bf16[2,32,96], index: 7, kind: input, shape index: {}]   ;;  %s3847_s8 = inlined_call_operand.vmem [shape: bf16[2,32,32], index: 8, kind: input, shape index: {}]   ;;  %s3848_s9 = inlined_call_operand.vmem [shape: f32[2,1,32], index: 9, kind: input, shape index: {}]   ;;  %s3849_s10 = inlined_call_operand.vmem [shape: bf16[2,32,128], index: 10, kind: input, shape index: {}]   ;;  %s3850_s11 = inlined_call_operand.vmem [shape: bf16[2,64,32], index: 11, kind: input, shape index: {}]   ;;  %s3851_s12 = inlined_call_operand.vmem [shape: f32[1,32], index: 12, kind: input, shape index: {}]   ;;  %s3852_s13 = inlined_call_operand.vmem [shape: bf16[32,16], index: 13, kind: input, shape index: {}]   ;;  %s3853_s14 = inlined_call_operand.vmem [shape: f32[1,16], index: 14, kind: input, shape index: {}]   ;;  %s3854_s15 = inlined_call_operand.vmem [shape: f32[2,8,16], index: 15, kind: input, shape index: {}]   ;;  %s3855_s16 = inlined_call_operand.hbm [shape: f32[2,8,16], index: 16, kind: output, shape index: {0}]   ;;  %s3856_s17 = inlined_call_operand.hbm [shape: f32[2,8,16], index: 17, kind: output, shape index: {1}]  }
   0x1   :  { %3859 = sst [smem:[#allocation8_spill]] %s3839_s0 }
   0x2   :  { %3860 = sst [smem:[#allocation9_spill]] %s3840_s1 }
   0x3   :  { %23 = vsyncpa [#allocation3], 0  ;;  %v2767_v0 = vld [vmem:[%s3841_s2] sm:$0xff]   ;;  %v3002_v1 = vmov 0.0   ;;  %s3861_s28 = sld [smem:[#allocation9_spill]]  ;;  %vm76_vm0 = vcmask 130048  }
   0x4   :  { %2494 = vmatprep.subr.bf16.mxu0 %v3002_v1  ;;  %2500 = vmatprep.subr.bf16.mxu1 %v3002_v1  ;;  %vm3003_vm1 = vmmov 0  }
   0x5   :  { %2495 = vmatpush3.bf16.msra.mxu0 %v2767_v0  ;;  %2501 = vmatpush3.bf16.msra.mxu1 %v2767_v0 }
   0x6   :  { %2496 = vmatprep.mubr.msk.bf16.mxu0 %vm3003_vm1, %v3002_v1  ;;  %2502 = vmatprep.mubr.msk.bf16.mxu1 %vm3003_vm1, %v3002_v1 }
   0x9   :  { %v60_v2 = vld [vmem:[%s3861_s28] sm:$0xf]  ;;  %v2302_v3 = vld [vmem:[%s3861_s28 + $0x4] sm:$0xf] }
   0xa   :  { %2497 = vmatmul.mubr.msk.bf16.vlgmr.msra.gmra.mxu0 %vm76_vm0, %v60_v2  ;;  %2503 = vmatmul.mubr.msk.bf16.vlgmr.msra.gmra.mxu1 %vm76_vm0, %v2302_v3 }
   0xb   :  { %24 = vsyncpa [#allocation5], 0  ;;  %v2299_v4 = vld [vmem:[%s3842_s3] ss:$0 sm:$0xff]  ;;  %v59_v7 = vld [vmem:[%s3843_s4 + $0x8] sm:$0xf] }
   0xc   :  { %s3862_s21 = sld [smem:[#allocation8_spill]]  ;;  %vm124_vm2 = vcmask 1043456   ;;  %v58_v15 = vld [vmem:[%s3843_s4] sm:$0xff]  ;;  %vm204_vm3 = vcmask 261120   ;;  %v2768_v37 = vld [vmem:[%s3846_s7 + $0x8] sm:$0xff]   ;;  %s3004_s0 = smov 112  }
   0xd   :  { %v2769_v38 = vld [vmem:[%s3846_s7] sm:$0xff]   ;;  %2506 = vmatprep.subr.bf16.mxu0 %v2768_v37  ;;  %s3005_s2 = smov 104   ;;  %s3006_s30 = smov 120   ;;  %vm401_vm4 = vcmask 64512   ;;  %vm519_vm5 = vcmask 785408   ;;  %vm808_vm6 = vcmask 195584  }
   0xe   :  { %2507 = vmatpush3.bf16.msra.mxu0 %v2768_v37  ;;  %v2305_v52 = vld [vmem:[%s3845_s6] ss:$0 sm:$0xff]  ;;  %s3007_s18 = smov 96   ;;  %s3008_s19 = smov 64   ;;  %vm1105_vm7 = vcmask 523264  }
   0xf   :  { %2508 = vmatprep.subr.bf16.mxu0 %v2769_v38  ;;  %s3009_s1 = smov 8   ;;  %s3010_s22 = smov 24  }
  0x10   :  { %s3011_s23 = smov 16   ;;  %s3012_s4 = smov [#allocation2]  }
  0x11   :  { %s2272_s25 = sshll.u32 %s3012_s4, 4  ;;  %s2273_s25 = int_to_ptr.vmem [resolvable:$true] %s2272_s25 }
  0x12   :  { %v120_v10 = vld [vmem:[%s3862_s21] sm:$0xf]  ;;  %v2304_v11 = vld [vmem:[%s3862_s21 + $0x4] sm:$0xf]  ;;  %2509 = vmatpush3.bf16.msra.mxu0 %v2769_v38  ;;  %p2963_p1 = scmp.lt.s32.totalorder %s2273_s25, %s2273_s25 }
  0xca   :  { %v114_v5 = vpop.f32.mrf.mxu0  ;;  %v167_v6 = vpop.f32.mrf.mxu1 }
  0xcb   :  { %v115_v8 = vadd.f32 %v2299_v4, %v114_v5  ;;  %v168_v9 = vadd.f32 %v2299_v4, %v167_v6 }
  0xcc   :  { %v2498_v12 = vpop.f32.mrf.mxu0  ;;  %v2504_v13 = vpop.f32.mrf.mxu1 }
  0xcd   :  { %v122_v14 = vrot.slane %v115_v8, 4  ;;  %v176_v16 = vrot.slane %v168_v9, 4 }
  0xce   :  { %v117_v17 = vpop.f32.mrf.mxu0  ;;  %v170_v18 = vpop.f32.mrf.mxu1 }
  0xcf   :  { %v125_v19 = vsel %vm124_vm2, %v120_v10, %v122_v14  ;;  %v178_v20 = vsel %vm124_vm2, %v2304_v11, %v176_v16  ;;  %v180_v21 = vadd.f32 %v176_v16, %v59_v7  ;;  %v127_v27 = vadd.f32 %v122_v14, %v59_v7 }
  0xd0   :  { %v179_v22 = vadd.f32 %v178_v20, %v58_v15  ;;  %v2499_v23 = vpop.f32.mrf.mxu0  ;;  %v2505_v24 = vpop.f32.mrf.mxu1  ;;  %v3139_v25 = vadd.f32 %v125_v19, %v58_v15 }
  0xd1   :  { %v184_v26 = vrot.slane %v180_v21, 4 }
  0xd2   :  { %v183_v28 = vrot.slane %v179_v22, 4  ;;  %v201_v29 = vmul.f32 %v3139_v25, %v3139_v25 }
  0xd4   :  { %v205_v30 = vsel %vm204_vm3, %v201_v29, 0.0  ;;  %v3145_v31 = vsel %vm124_vm2, %v183_v28, %v184_v26  ;;  %v3148_v32 = vsel %vm124_vm2, %v127_v27, %v183_v28 }
  0xd5   :  { %206 = vadd.xlane.f32.xlu0 %v205_v30  ;;  %v203_v33 = vmul.f32 %v3145_v31, %v3145_v31  ;;  %v202_v34 = vmul.f32 %v3148_v32, %v3148_v32 }
  0xd7   :  { %v211_v35 = vsel %vm204_vm3, %v203_v33, 0.0  ;;  %v208_v36 = vsel %vm204_vm3, %v202_v34, 0.0 }
  0xd8   :  { %212 = vadd.xlane.f32.xlu1 %v211_v35 }
  0xd9   :  { %209 = vadd.xlane.f32.xlu0 %v208_v36 }
 0x15e   :  { %v207_v39 = vpop.xlane.xlu0 %206 }
 0x15f   :  { %v215_v40 = vmul.f32 0.03125, %v207_v39 }
 0x161   :  { %v218_v41 = vadd.f32 1e-05, %v215_v40  ;;  %v213_v42 = vpop.xlane.xlu1 %212 }
 0x162   :  { %v217_v43 = vmul.f32 0.03125, %v213_v42  ;;  %v210_v44 = vpop.xlane.xlu0 %209 }
 0x163   :  { %2790 = vrsqrt.f32 %v218_v41  ;;  %v216_v45 = vmul.f32 0.03125, %v210_v44 }
 0x164   :  { %v220_v46 = vadd.f32 1e-05, %v217_v43 }
 0x165   :  { %v219_v47 = vadd.f32 1e-05, %v216_v45 }
 0x166   :  { %2792 = vrsqrt.f32 %v220_v46 }
 0x167   :  { %2794 = vrsqrt.f32 %v219_v47 }
 0x170   :  { %v2791_v48 = vpop.eup %2790 }
 0x171   :  { %v224_v50 = vmul.f32 %v2791_v48, %v3139_v25 }
 0x173   :  { %v2793_v49 = vpop.eup %2792  ;;  %v234_v56 = vmul.f32 %v2305_v52, %v224_v50 }
 0x174   :  { %v2795_v51 = vpop.eup %2794  ;;  %v226_v53 = vmul.f32 %v2793_v49, %v3145_v31 }
 0x175   :  { %v225_v54 = vmul.f32 %v2795_v51, %v3148_v32 }
 0x176   :  { %v236_v55 = vmul.f32 %v2305_v52, %v226_v53 }
 0x177   :  { %v235_v57 = vmul.f32 %v2305_v52, %v225_v54 }
 0x178   :  { %v238_v59 = vpack.c.bf16 %v236_v55, %v236_v55 }
 0x179   :  { %v237_v58 = vpack.c.bf16 %v235_v57, %v234_v56 }
 0x17b   :  { %2510 = vmatprep.mubr.msk.bf16.mxu0 %vm204_vm3, %v237_v58 }
 0x17c   :  { %2511 = vmatmul.mubr.msk.bf16.vlgmr.msra.gmra.mxu0 %vm204_vm3, %v238_v59 }
 0x23c   :  { %v2512_v60 = vpop.f32.mrf.mxu0 }
 0x23d   :  { %v333_v61 = vrot.slane %v2512_v60, 4 }
 0x23e   :  { %v295_v62 = vpop.f32.mrf.mxu0 }
 0x23f   :  { %345 = vrot.lane.b32.xlu1 %v333_v61, %s3004_s0  ;;  %v311_v3 = vrot.slane %v295_v62, 4  ;;  %v359_v26 = vmul.f32 0.35355338, %v295_v62 }
 0x240   :  { %v2513_v63 = vpop.f32.mrf.mxu0 }
 0x241   :  { %v191_v63 = vld [vmem:[%s3844_s5 + $0x10] sm:$0xff] }
 0x242   :  { %v298_v0 = vpop.f32.mrf.mxu0 }
 0x243   :  { %351 = vrot.lane.b32.xlu1 %v2512_v60, %s3005_s2  ;;  %349 = vrot.lane.b32.xlu0 %v298_v0, %s3005_s2  ;;  %v312_v2 = vrot.slane %v298_v0, 4 }
 0x245   :  { %v3176_v4 = vsel %vm124_vm2, %v312_v2, %v333_v61  ;;  %v313_v5 = vsel %vm124_vm2, %v311_v3, %v312_v2  ;;  %v189_v2 = vld [vmem:[%s3844_s5] sm:$0xff] }
 0x246   :  { %v365_v56 = vmul.f32 0.35355338, %v3176_v4 }
 0x247   :  { %339 = vrot.lane.b32.xlu1 %v2512_v60, %s3006_s30  ;;  %337 = vrot.lane.b32.xlu0 %v298_v0, %s3006_s30 }
 0x24b   :  { %326 = vrot.lane.b32.xlu0 %v311_v3, %s3005_s2  ;;  %343 = vrot.lane.b32.xlu1 %v3176_v4, %s3004_s0 }
 0x24f   :  { %322 = vrot.lane.b32.xlu1 %v298_v0, %s3004_s0  ;;  %316 = vrot.lane.b32.xlu0 %v313_v5, %s3006_s30 }
 0x253   :  { %314 = vrot.lane.b32.xlu0 %v311_v3, %s3006_s30  ;;  %328 = vrot.lane.b32.xlu1 %v313_v5, %s3005_s2  ;;  %v192_v5 = vld [vmem:[%s3844_s5 + $0x18] sm:$0xff] }
 0x257   :  { %320 = vrot.lane.b32.xlu1 %v295_v62, %s3004_s0 }
 0x2b1   :  { %v346_v6 = vpop.permute.xlu1 %345 }
 0x2b5   :  { %v3187_v7 = vpop.permute.xlu1 %351  ;;  %v350_v8 = vpop.permute.xlu0 %349 }
 0x2b6   :  { %v3190_v9 = vsel %vm124_vm2, %v346_v6, %v350_v8  ;;  %v370_v60 = vmul.f32 0.35355338, %v3187_v7 }
 0x2b7   :  { %v382_v10 = vpack.c.bf16 %v3187_v7, %v3190_v9 }
 0x2b9   :  { %v3194_v11 = vpop.permute.xlu1 %339  ;;  %v338_v12 = vpop.permute.xlu0 %337  ;;  %399 = vrot.lane.b32.xlu1 %v382_v10, %s3007_s18 }
 0x2ba   :  { %v3198_v13 = vsel %vm124_vm2, %v333_v61, %v338_v12  ;;  %v367_v57 = vmul.f32 0.35355338, %v3194_v11  ;;  %v369_v61 = vmul.f32 0.35355338, %v3190_v9  ;;  %v190_v9 = vld [vmem:[%s3844_s5 + $0x8] sm:$0xff] }
 0x2bb   :  { %v3202_v14 = vpack.c.bf16 %v3198_v13, %v3176_v4  ;;  %v366_v54 = vmul.f32 0.35355338, %v3198_v13  ;;  %v195_v13 = vld [vmem:[%s3844_s5 + $0x30] sm:$0xff] }
 0x2bd   :  { %v327_v15 = vpop.permute.xlu0 %326  ;;  %v3204_v16 = vpop.permute.xlu1 %343  ;;  %395 = vrot.lane.b32.xlu1 %v3202_v14, %s3007_s18  ;;  %v374_v58 = vpack.c.bf16 %v366_v54, %v365_v56 }
 0x2be   :  { %v381_v17 = vpack.c.bf16 %v3204_v16, %v3194_v11  ;;  %v368_v55 = vmul.f32 0.35355338, %v3204_v16 }
 0x2c0   :  { %397 = vrot.lane.b32.xlu0 %v381_v17, %s3007_s18  ;;  %v375_v59 = vpack.c.bf16 %v368_v55, %v367_v57 }
 0x2c1   :  { %v323_v18 = vpop.permute.xlu1 %322  ;;  %v317_v19 = vpop.permute.xlu0 %316 }
 0x2c2   :  { %v356_v20 = vsel %vm124_vm2, %v323_v18, %v327_v15  ;;  %v361_v50 = vmul.f32 0.35355338, %v317_v19  ;;  %v193_v18 = vld [vmem:[%s3844_s5 + $0x20] sm:$0xff] }
 0x2c3   :  { %v363_v51 = vmul.f32 0.35355338, %v356_v20 }
 0x2c5   :  { %v315_v21 = vpop.permute.xlu0 %314  ;;  %v329_v22 = vpop.permute.xlu1 %328 }
 0x2c6   :  { %v355_v23 = vsel %vm124_vm2, %v298_v0, %v315_v21  ;;  %v3213_v24 = vpack.c.bf16 %v329_v22, %v356_v20  ;;  %v364_v49 = vmul.f32 0.35355338, %v329_v22  ;;  %v196_v21 = vld [vmem:[%s3844_s5 + $0x38] sm:$0xff] }
 0x2c7   :  { %v360_v27 = vmul.f32 0.35355338, %v355_v23  ;;  %v3217_v30 = vpack.c.bf16 %v355_v23, %v295_v62  ;;  %v376_v62 = vpack.c.bf16 %v370_v60, %v369_v61 }
 0x2c8   :  { %393 = vrot.lane.b32.xlu0 %v3213_v24, %s3007_s18  ;;  %v373_v53 = vpack.c.bf16 %v364_v49, %v363_v51 }
 0x2c9   :  { %v371_v28 = vpack.c.bf16 %v360_v27, %v359_v26  ;;  %v321_v29 = vpop.permute.xlu1 %320 }
 0x2ca   :  { %v3219_v33 = vpack.c.bf16 %v321_v29, %v317_v19  ;;  %v362_v48 = vmul.f32 0.35355338, %v321_v29 }
 0x2cb   :  { %2526 = vmatprep.mubr.msk.bf16.mxu1 %vm401_vm4, %v371_v28  ;;  %v194_v28 = vld [vmem:[%s3844_s5 + $0x28] sm:$0xff] }
 0x2cc   :  { %389 = vrot.lane.b32.xlu0 %v3217_v30, %s3007_s18  ;;  %391 = vrot.lane.b32.xlu1 %v3219_v33, %s3007_s18  ;;  %v372_v52 = vpack.c.bf16 %v362_v48, %v361_v50  ;;  %v198_v48 = vld [vmem:[%s3844_s5 + $0x48] sm:$0xff] }
 0x2d0   :  { %668 = vrot.lane.b32.xlu1 %v382_v10, %s3008_s19 }
 0x2d4   :  { %666 = vrot.lane.b32.xlu1 %v381_v17, %s3008_s19 }
 0x32b   :  { %v400_v34 = vpop.permute.xlu1 %399 }
 0x32c   :  { %2682 = vmatprep.subr.msk.bf16.mxu1 %vm401_vm4, %v400_v34  ;;  %v436_v35 = vsel %vm401_vm4, %v400_v34, 0 }
 0x32d   :  { %2515 = vmatpush3.bf16.xpose.msra.mxu1 %v436_v35  ;;  %v199_v35 = vld [vmem:[%s3844_s5 + $0x50] sm:$0xff] }
 0x32f   :  { %v396_v38 = vpop.permute.xlu1 %395 }
 0x330   :  { %v430_v39 = vsel %vm401_vm4, %v396_v38, 0 }
 0x332   :  { %v398_v36 = vpop.permute.xlu0 %397 }
 0x333   :  { %2683 = vmatprep.subr.msk.bf16.mxu1 %vm401_vm4, %v398_v36  ;;  %v433_v37 = vsel %vm401_vm4, %v398_v36, 0 }
 0x335   :  { %2517 = vmatpush3.bf16.xpose.msra.mxu1 %v433_v37 }
 0x336   :  { %2684 = vmatprep.subr.msk.bf16.mxu1 %vm401_vm4, %v396_v38 }
 0x33a   :  { %v394_v40 = vpop.permute.xlu0 %393 }
 0x33b   :  { %v427_v43 = vsel %vm401_vm4, %v394_v40, 0 }
 0x33d   :  { %2519 = vmatpush3.bf16.xpose.msra.mxu1 %v430_v39 }
 0x33e   :  { %2685 = vmatprep.subr.msk.bf16.mxu1 %vm401_vm4, %v394_v40  ;;  %v392_v41 = vpop.permute.xlu1 %391  ;;  %v390_v46 = vpop.permute.xlu0 %389  ;;  %v197_v40 = vld [vmem:[%s3844_s5 + $0x40] sm:$0xff] }
 0x33f   :  { %v424_v45 = vsel %vm401_vm4, %v392_v41, 0  ;;  %v421_v47 = vsel %vm401_vm4, %v390_v46, 0 }
 0x342   :  { %v669_v42 = vpop.permute.xlu1 %668 }
 0x343   :  { %2538 = vmatprep.subr.bf16.mxu0 %v669_v42 }
 0x344   :  { %2539 = vmatpush3.bf16.msra.mxu0 %v669_v42 }
 0x345   :  { %2521 = vmatpush3.bf16.xpose.msra.mxu1 %v427_v43  ;;  %v200_v43 = vld [vmem:[%s3844_s5 + $0x58] sm:$0xff] }
 0x346   :  { %2686 = vmatprep.subr.msk.bf16.mxu1 %vm401_vm4, %v392_v41  ;;  %v667_v44 = vpop.permute.xlu1 %666 }
 0x347   :  { %2540 = vmatprep.subr.bf16.mxu0 %v667_v44 }
 0x348   :  { %2541 = vmatpush3.bf16.msra.mxu0 %v667_v44 }
 0x34d   :  { %2523 = vmatpush3.bf16.xpose.msra.mxu1 %v424_v45 }
 0x34e   :  { %2687 = vmatprep.subr.msk.bf16.mxu1 %vm401_vm4, %v390_v46 }
 0x355   :  { %2525 = vmatpush3.bf16.xpose.msra.mxu1 %v421_v47 }
 0x35c   :  { %2527 = vmatmul.mubr.msk.bf16.vlgmr.msra.gmra.mxu1 %vm401_vm4, %v372_v52 }
 0x35d   :  { %2530 = vmatprep.mubr.msk.bf16.mxu1 %vm401_vm4, %v373_v53 }
 0x364   :  { %2531 = vmatmul.mubr.msk.bf16.gmra.mxu1 %vm401_vm4, %v374_v58 }
 0x365   :  { %2534 = vmatprep.mubr.msk.bf16.mxu1 %vm401_vm4, %v375_v59 }
 0x36c   :  { %2535 = vmatmul.mubr.msk.bf16.gmra.mxu1 %vm401_vm4, %v376_v62 }
 0x41c   :  { %v2528_v0 = vpop.f32.mrf.mxu1 }
 0x41d   :  { %v481_v3 = vadd.f32 %v2528_v0, %v191_v63 }
 0x41e   :  { %v472_v4 = vpop.f32.mrf.mxu1 }
 0x41f   :  { %v3260_v6 = vadd.f32 %v472_v4, %v189_v2  ;;  %v526_v7 = vsel %vm519_vm5, %v481_v3, -inf }
 0x420   :  { %527 = vmax.xlane.f32.xlu0 %v526_v7  ;;  %v2529_v8 = vpop.f32.mrf.mxu1 }
 0x421   :  { %v484_v10 = vadd.f32 %v2529_v8, %v192_v5  ;;  %v520_v11 = vsel %vm519_vm5, %v3260_v6, -inf }
 0x422   :  { %v475_v12 = vpop.f32.mrf.mxu1  ;;  %521 = vmax.xlane.f32.xlu1 %v520_v11 }
 0x423   :  { %v476_v15 = vadd.f32 %v475_v12, %v190_v9  ;;  %v529_v16 = vsel %vm519_vm5, %v484_v10, -inf }
 0x424   :  { %530 = vmax.xlane.f32.xlu0 %v529_v16  ;;  %v2532_v17 = vpop.f32.mrf.mxu1 }
 0x425   :  { %v497_v19 = vadd.f32 %v2532_v17, %v195_v13  ;;  %v523_v23 = vsel %vm519_vm5, %v476_v15, -inf }
 0x426   :  { %v488_v20 = vpop.f32.mrf.mxu1 }
 0x427   :  { %v489_v22 = vadd.f32 %v488_v20, %v193_v18  ;;  %v538_v26 = vsel %vm519_vm5, %v497_v19, -inf }
 0x428   :  { %v2533_v27 = vpop.f32.mrf.mxu1  ;;  %524 = vmax.xlane.f32.xlu0 %v523_v23  ;;  %539 = vmax.xlane.f32.xlu1 %v538_v26 }
 0x429   :  { %v500_v29 = vadd.f32 %v2533_v27, %v196_v21  ;;  %v532_v38 = vsel %vm519_vm5, %v489_v22, -inf }
 0x42a   :  { %v491_v34 = vpop.f32.mrf.mxu1 }
 0x42b   :  { %v3286_v36 = vadd.f32 %v491_v34, %v194_v28  ;;  %v541_v37 = vsel %vm519_vm5, %v500_v29, -inf }
 0x42c   :  { %v2536_v39 = vpop.f32.mrf.mxu1  ;;  %542 = vmax.xlane.f32.xlu0 %v541_v37  ;;  %533 = vmax.xlane.f32.xlu1 %v532_v38 }
 0x42d   :  { %v513_v41 = vadd.f32 %v2536_v39, %v199_v35  ;;  %v535_v45 = vsel %vm519_vm5, %v3286_v36, -inf }
 0x42e   :  { %v504_v42 = vpop.f32.mrf.mxu1 }
 0x42f   :  { %v505_v44 = vadd.f32 %v504_v42, %v197_v40  ;;  %v550_v46 = vsel %vm519_vm5, %v513_v41, -inf }
 0x430   :  { %v2537_v47 = vpop.f32.mrf.mxu1  ;;  %536 = vmax.xlane.f32.xlu0 %v535_v45  ;;  %551 = vmax.xlane.f32.xlu1 %v550_v46 }
 0x431   :  { %v516_v49 = vadd.f32 %v2537_v47, %v200_v43  ;;  %v544_v53 = vsel %vm519_vm5, %v505_v44, -inf }
 0x432   :  { %v507_v50 = vpop.f32.mrf.mxu1 }
 0x433   :  { %v3302_v51 = vadd.f32 %v507_v50, %v198_v48  ;;  %v553_v52 = vsel %vm519_vm5, %v516_v49, -inf }
 0x434   :  { %554 = vmax.xlane.f32.xlu0 %v553_v52  ;;  %545 = vmax.xlane.f32.xlu1 %v544_v53 }
 0x435   :  { %v547_v54 = vsel %vm519_vm5, %v3302_v51, -inf }
 0x438   :  { %548 = vmax.xlane.f32.xlu0 %v547_v54 }
 0x445   :  { %662 = vrot.lane.b32.xlu1 %v3213_v24, %s3008_s19 }
 0x44e   :  { %664 = vrot.lane.b32.xlu0 %v3202_v14, %s3008_s19 }
 0x4a9   :  { %v528_v55 = vpop.xlane.xlu0 %527 }
 0x4aa   :  { %v558_v56 = vsub.f32 %v481_v3, %v528_v55 }
 0x4ab   :  { %v522_v57 = vpop.xlane.xlu1 %521 }
 0x4ac   :  { %v572_v58 = vmul.f32 1.442695, %v558_v56  ;;  %v556_v59 = vsub.f32 %v3260_v6, %v522_v57 }
 0x4ad   :  { %v531_v60 = vpop.xlane.xlu0 %530 }
 0x4ae   :  { %2796 = vpow2.f32 %v572_v58  ;;  %v568_v61 = vmul.f32 1.442695, %v556_v59  ;;  %v559_v62 = vsub.f32 %v484_v10, %v531_v60 }
 0x4b0   :  { %2798 = vpow2.f32 %v568_v61  ;;  %v574_v63 = vmul.f32 1.442695, %v559_v62 }
 0x4b1   :  { %v525_v0 = vpop.xlane.xlu0 %524  ;;  %v540_v2 = vpop.xlane.xlu1 %539 }
 0x4b2   :  { %2800 = vpow2.f32 %v574_v63  ;;  %v557_v4 = vsub.f32 %v476_v15, %v525_v0  ;;  %v562_v24 = vsub.f32 %v497_v19, %v540_v2 }
 0x4b4   :  { %v570_v5 = vmul.f32 1.442695, %v557_v4  ;;  %v580_v7 = vmul.f32 1.442695, %v562_v24 }
 0x4b5   :  { %v543_v14 = vpop.xlane.xlu0 %542  ;;  %v534_v8 = vpop.xlane.xlu1 %533 }
 0x4b6   :  { %2802 = vpow2.f32 %v570_v5  ;;  %v563_v3 = vsub.f32 %v500_v29, %v543_v14  ;;  %v560_v9 = vsub.f32 %v489_v22, %v534_v8 }
 0x4b7   :  { %2804 = vpow2.f32 %v580_v7 }
 0x4b8   :  { %v576_v6 = vmul.f32 1.442695, %v560_v9  ;;  %v582_v13 = vmul.f32 1.442695, %v563_v3 }
 0x4b9   :  { %v537_v11 = vpop.xlane.xlu0 %536  ;;  %v552_v12 = vpop.xlane.xlu1 %551 }
 0x4ba   :  { %v566_v10 = vsub.f32 %v513_v41, %v552_v12  ;;  %2806 = vpow2.f32 %v576_v6  ;;  %v561_v17 = vsub.f32 %v3286_v36, %v537_v11 }
 0x4bb   :  { %v3313_v16 = vpop.eup %2796  ;;  %2808 = vpow2.f32 %v582_v13 }
 0x4bc   :  { %v588_v15 = vmul.f32 1.442695, %v566_v10  ;;  %v598_v18 = vsel %vm519_vm5, %v3313_v16, 0.0  ;;  %v578_v27 = vmul.f32 1.442695, %v561_v17 }
 0x4bd   :  { %v3318_v19 = vpop.eup %2798  ;;  %v555_v20 = vpop.xlane.xlu0 %554  ;;  %599 = vadd.xlane.f32.xlu1 %v598_v18 }
 0x4be   :  { %v546_v21 = vpop.xlane.xlu1 %545  ;;  %v567_v22 = vsub.f32 %v516_v49, %v555_v20  ;;  %2810 = vpow2.f32 %v588_v15  ;;  %v592_v34 = vsel %vm519_vm5, %v3318_v19, 0.0 }
 0x4bf   :  { %v564_v23 = vsub.f32 %v505_v44, %v546_v21  ;;  %v3320_v26 = vpop.eup %2800 }
 0x4c0   :  { %v601_v29 = vsel %vm519_vm5, %v3320_v26, 0.0  ;;  %v590_v35 = vmul.f32 1.442695, %v567_v22 }
 0x4c1   :  { %v584_v28 = vmul.f32 1.442695, %v564_v23  ;;  %602 = vadd.xlane.f32.xlu0 %v601_v29  ;;  %v549_v36 = vpop.xlane.xlu0 %548  ;;  %593 = vadd.xlane.f32.xlu1 %v592_v34 }
 0x4c2   :  { %v565_v37 = vsub.f32 %v3302_v51, %v549_v36  ;;  %v663_v43 = vpop.permute.xlu1 %662 }
 0x4c3   :  { %v2803_v38 = vpop.eup %2802  ;;  %2812 = vpow2.f32 %v584_v28 }
 0x4c4   :  { %2814 = vpow2.f32 %v578_v27  ;;  %v586_v39 = vmul.f32 1.442695, %v565_v37  ;;  %v595_v40 = vsel %vm519_vm5, %v2803_v38, 0.0  ;;  %v3328_v41 = vpop.eup %2804 }
 0x4c5   :  { %2816 = vpow2.f32 %v590_v35  ;;  %596 = vadd.xlane.f32.xlu0 %v595_v40  ;;  %v665_v42 = vpop.permute.xlu0 %664  ;;  %v610_v44 = vsel %vm519_vm5, %v3328_v41, 0.0 }
 0x4c6   :  { %2542 = vmatprep.subr.bf16.mxu0 %v665_v42  ;;  %2818 = vpow2.f32 %v586_v39 }
 0x4c7   :  { %2543 = vmatpush3.bf16.msra.mxu0 %v665_v42  ;;  %v3332_v45 = vpop.eup %2806 }
 0x4c8   :  { %2544 = vmatprep.subr.bf16.mxu0 %v663_v43  ;;  %v3334_v46 = vpop.eup %2808  ;;  %v604_v48 = vsel %vm519_vm5, %v3332_v45, 0.0 }
 0x4c9   :  { %611 = vadd.xlane.f32.xlu0 %v610_v44  ;;  %v613_v51 = vsel %vm519_vm5, %v3334_v46, 0.0 }
 0x4cb   :  { %2545 = vmatpush3.bf16.msra.mxu0 %v663_v43  ;;  %v3336_v47 = vpop.eup %2810 }
 0x4cc   :  { %v622_v49 = vsel %vm519_vm5, %v3336_v47, 0.0 }
 0x4cd   :  { %605 = vadd.xlane.f32.xlu0 %v604_v48  ;;  %623 = vadd.xlane.f32.xlu1 %v622_v49 }
 0x4d0   :  { %v3342_v50 = vpop.eup %2812 }
 0x4d1   :  { %v2815_v52 = vpop.eup %2814  ;;  %614 = vadd.xlane.f32.xlu0 %v613_v51  ;;  %v616_v53 = vsel %vm519_vm5, %v3342_v50, 0.0 }
 0x4d2   :  { %v3348_v54 = vpop.eup %2816  ;;  %617 = vadd.xlane.f32.xlu1 %v616_v53  ;;  %v607_v55 = vsel %vm519_vm5, %v2815_v52, 0.0 }
 0x4d3   :  { %v2819_v56 = vpop.eup %2818  ;;  %v625_v57 = vsel %vm519_vm5, %v3348_v54, 0.0 }
 0x4d4   :  { %v619_v58 = vsel %vm519_vm5, %v2819_v56, 0.0 }
 0x4d5   :  { %608 = vadd.xlane.f32.xlu0 %v607_v55  ;;  %v2771_v55 = vld [vmem:[%s3847_s8] sm:$0xff]  }
 0x4d6   :  { %626 = vadd.xlane.f32.xlu1 %v625_v57 }
 0x4d9   :  { %620 = vadd.xlane.f32.xlu0 %v619_v58 }
 0x4e7   :  { %658 = vrot.lane.b32.xlu1 %v3217_v30, %s3008_s19 }
 0x4ef   :  { %660 = vrot.lane.b32.xlu0 %v3219_v33, %s3008_s19 }
 0x546   :  { %v600_v59 = vpop.xlane.xlu1 %599 }
 0x54a   :  { %v603_v60 = vpop.xlane.xlu0 %602  ;;  %v594_v61 = vpop.xlane.xlu1 %593 }
 0x54b   :  { %2820 = vrcp.f32 %v594_v61 }
 0x54e   :  { %v597_v62 = vpop.xlane.xlu0 %596 }
 0x54f   :  { %2822 = vrcp.f32 %v597_v62 }
 0x550   :  { %2824 = vrcp.f32 %v603_v60 }
 0x551   :  { %2826 = vrcp.f32 %v600_v59 }
 0x552   :  { %v612_v63 = vpop.xlane.xlu0 %611 }
 0x556   :  { %v606_v0 = vpop.xlane.xlu0 %605  ;;  %v624_v2 = vpop.xlane.xlu1 %623 }
 0x557   :  { %2828 = vrcp.f32 %v606_v0 }
 0x558   :  { %v2821_v4 = vpop.eup %2820 }
 0x559   :  { %v640_v30 = vmul.f32 %v2821_v4, %v3318_v19 }
 0x55a   :  { %v615_v24 = vpop.xlane.xlu0 %614 }
 0x55b   :  { %v618_v7 = vpop.xlane.xlu1 %617 }
 0x55c   :  { %v2823_v5 = vpop.eup %2822 }
 0x55d   :  { %v641_v14 = vmul.f32 %v2823_v5, %v2803_v38  ;;  %v2825_v6 = vpop.eup %2824 }
 0x55e   :  { %v609_v33 = vpop.xlane.xlu0 %608  ;;  %v2827_v12 = vpop.eup %2826  ;;  %v643_v10 = vmul.f32 %v2825_v6, %v3320_v26 }
 0x55f   :  { %2830 = vrcp.f32 %v609_v33  ;;  %v652_v8 = vpack.c.bf16 %v641_v14, %v640_v30  ;;  %v627_v3 = vpop.xlane.xlu1 %626  ;;  %v642_v15 = vmul.f32 %v2827_v12, %v3313_v16 }
 0x560   :  { %2832 = vrcp.f32 %v615_v24 }
 0x561   :  { %2550 = vmatprep.mubr.msk.bf16.mxu0 %vm519_vm5, %v652_v8  ;;  %2834 = vrcp.f32 %v612_v63  ;;  %v653_v19 = vpack.c.bf16 %v643_v10, %v642_v15 }
 0x562   :  { %v621_v9 = vpop.xlane.xlu0 %620 }
 0x563   :  { %2836 = vrcp.f32 %v621_v9  ;;  %v659_v13 = vpop.permute.xlu1 %658 }
 0x564   :  { %2838 = vrcp.f32 %v618_v7  ;;  %v2829_v17 = vpop.eup %2828 }
 0x565   :  { %2840 = vrcp.f32 %v627_v3  ;;  %v644_v20 = vmul.f32 %v2829_v17, %v3332_v45 }
 0x566   :  { %v661_v11 = vpop.permute.xlu0 %660  ;;  %2842 = vrcp.f32 %v624_v2 }
 0x567   :  { %2546 = vmatprep.subr.bf16.mxu0 %v661_v11 }
 0x568   :  { %2547 = vmatpush3.bf16.msra.mxu0 %v661_v11 }
 0x569   :  { %2548 = vmatprep.subr.bf16.mxu0 %v659_v13 }
 0x56c   :  { %v2831_v18 = vpop.eup %2830  ;;  %2549 = vmatpush3.bf16.msra.mxu0 %v659_v13 }
 0x56d   :  { %v645_v21 = vmul.f32 %v2831_v18, %v2815_v52  ;;  %v2833_v22 = vpop.eup %2832 }
 0x56e   :  { %v2835_v23 = vpop.eup %2834  ;;  %v647_v26 = vmul.f32 %v2833_v22, %v3334_v46 }
 0x56f   :  { %2551 = vmatmul.mubr.msk.bf16.vlgmr.msra.gmra.mxu0 %vm519_vm5, %v653_v19  ;;  %v654_v27 = vpack.c.bf16 %v645_v21, %v644_v20  ;;  %v646_v16 = vmul.f32 %v2835_v23, %v3328_v41  ;;  %v2770_v41 = vld [vmem:[%s3847_s8 + $0x8] sm:$0xff]  }
 0x570   :  { %v2837_v28 = vpop.eup %2836  ;;  %2562 = vmatprep.subr.bf16.mxu0 %v2770_v41 }
 0x571   :  { %v2839_v29 = vpop.eup %2838  ;;  %2554 = vmatprep.mubr.msk.bf16.mxu0 %vm519_vm5, %v654_v27  ;;  %v649_v34 = vmul.f32 %v2837_v28, %v2819_v56  ;;  %v655_v36 = vpack.c.bf16 %v647_v26, %v646_v16  ;;  %2563 = vmatpush3.bf16.msra.mxu0 %v2770_v41 }
 0x572   :  { %v648_v35 = vmul.f32 %v2839_v29, %v3342_v50  ;;  %v2841_v37 = vpop.eup %2840  ;;  %2564 = vmatprep.subr.bf16.mxu0 %v2771_v55 }
 0x573   :  { %v2843_v39 = vpop.eup %2842  ;;  %v651_v40 = vmul.f32 %v2841_v37, %v3348_v54 }
 0x574   :  { %v656_v38 = vpack.c.bf16 %v649_v34, %v648_v35  ;;  %v650_v42 = vmul.f32 %v2843_v39, %v3336_v47 }
 0x575   :  { %2565 = vmatpush3.bf16.msra.mxu0 %v2771_v55 }
 0x576   :  { %v657_v43 = vpack.c.bf16 %v651_v40, %v650_v42 }
 0x577   :  { %2555 = vmatmul.mubr.msk.bf16.gmra.mxu0 %vm519_vm5, %v655_v36 }
 0x578   :  { %2558 = vmatprep.mubr.msk.bf16.mxu0 %vm519_vm5, %v656_v38 }
 0x57f   :  { %2559 = vmatmul.mubr.msk.bf16.gmra.mxu0 %vm519_vm5, %v657_v43 }
 0x62f   :  { %v2552_v44 = vpop.f32.mrf.mxu0 }
 0x630   :  { %v778_v49 = vrot.slane %v2552_v44, 4 }
 0x631   :  { %v3376_v45 = vpop.f32.mrf.mxu0 }
 0x633   :  { %v2553_v46 = vpop.f32.mrf.mxu0 }
 0x635   :  { %v3378_v48 = vpop.f32.mrf.mxu0 }
 0x636   :  { %v777_v50 = vrot.slane %v3378_v48, 4 }
 0x637   :  { %v2556_v51 = vpop.f32.mrf.mxu0 }
 0x638   :  { %v779_v47 = vsel %vm124_vm2, %v777_v50, %v778_v49 }
 0x639   :  { %v744_v52 = vpop.f32.mrf.mxu0  ;;  %v2707_v53 = vpack.i.bf16 %v779_v47, %v778_v49 }
 0x63a   :  { %v795_v24 = vrot.slane %v744_v52, 4  ;;  %v2722_v3 = vpack.i.bf16 %v2553_v46, %v744_v52 }
 0x63b   :  { %2708 = vrot.lane.b32.xlu1 %v2707_v53, %s3009_s1  ;;  %v2557_v54 = vpop.f32.mrf.mxu0 }
 0x63c   :  { %v813_v59 = vrot.slane %v2557_v54, 4 }
 0x63d   :  { %v747_v56 = vpop.f32.mrf.mxu0 }
 0x63e   :  { %v796_v62 = vrot.slane %v747_v56, 4 }
 0x63f   :  { %v2560_v57 = vpop.f32.mrf.mxu0 }
 0x640   :  { %v831_v63 = vrot.slane %v2560_v57, 4  ;;  %v797_v14 = vsel %vm124_vm2, %v795_v24, %v796_v62 }
 0x641   :  { %v760_v58 = vpop.f32.mrf.mxu0  ;;  %v2732_v8 = vpack.i.bf16 %v797_v14, %v796_v62 }
 0x642   :  { %v814_v60 = vrot.slane %v760_v58, 4 }
 0x643   :  { %v2561_v61 = vpop.f32.mrf.mxu0 }
 0x644   :  { %v815_v0 = vsel %vm124_vm2, %v813_v59, %v814_v60  ;;  %v832_v2 = vrot.slane %v2561_v61, 4 }
 0x645   :  { %v2712_v4 = vpack.i.bf16 %v814_v60, %v815_v0  ;;  %v763_v7 = vpop.f32.mrf.mxu0 }
 0x646   :  { %v833_v5 = vsel %vm124_vm2, %v831_v63, %v832_v2  ;;  %v2717_v33 = vpack.i.bf16 %v2560_v57, %v763_v7 }
 0x647   :  { %v2727_v30 = vpack.i.bf16 %v832_v2, %v833_v5  ;;  %2713 = vrot.lane.b32.xlu1 %v2712_v4, %s3009_s1 }
 0x649   :  { %2728 = vrot.lane.b32.xlu0 %v2727_v30, %s3010_s22 }
 0x64b   :  { %2718 = vrot.lane.b32.xlu1 %v2717_v33, %s3011_s23 }
 0x64d   :  { %2733 = vrot.lane.b32.xlu0 %v2732_v8, %s3010_s22 }
 0x64f   :  { %2723 = vrot.lane.b32.xlu1 %v2722_v3, %s3011_s23 }
 0x6ad   :  { %v2709_v9 = vpop.permute.xlu1 %2708 }
 0x6ae   :  { %v2711_v17 = vunpack.i.h.bf16 %v2709_v9  ;;  %v2710_v15 = vunpack.i.l.bf16 %v2709_v9  ;;  %v2326_v9 = vld [vmem:[%s3848_s9] ss:$0 sm:$0xff] }
 0x6b0   :  { %v804_v39 = vsel %vm401_vm4, %v3376_v45, %v2711_v17  ;;  %v805_v40 = vsel %vm401_vm4, %v3378_v48, %v2710_v15 }
 0x6b9   :  { %v2714_v6 = vpop.permute.xlu1 %2713 }
 0x6ba   :  { %v2716_v11 = vunpack.i.h.bf16 %v2714_v6  ;;  %v2715_v12 = vunpack.i.l.bf16 %v2714_v6 }
 0x6bb   :  { %v2729_v13 = vpop.permute.xlu0 %2728 }
 0x6bc   :  { %v841_v20 = vsel %vm401_vm4, %v2557_v54, %v2716_v11  ;;  %v840_v21 = vsel %vm401_vm4, %v2556_v51, %v2715_v12  ;;  %v2731_v22 = vunpack.i.h.bf16 %v2729_v13  ;;  %v2730_v23 = vunpack.i.l.bf16 %v2729_v13 }
 0x6bd   :  { %v2719_v10 = vpop.permute.xlu1 %2718 }
 0x6be   :  { %v2721_v18 = vunpack.i.h.bf16 %v2719_v10  ;;  %v2720_v19 = vunpack.i.l.bf16 %v2719_v10 }
 0x6bf   :  { %v2734_v29 = vpop.permute.xlu0 %2733 }
 0x6c0   :  { %v843_v27 = vsel %vm76_vm0, %v841_v20, %v2721_v18  ;;  %v842_v28 = vsel %vm76_vm0, %v840_v21, %v2720_v19  ;;  %v2736_v42 = vunpack.i.h.bf16 %v2734_v29  ;;  %v2735_v43 = vunpack.i.l.bf16 %v2734_v29  ;;  %v2774_v19 = vld [vmem:[%s3850_s11 + $0x18] sm:$0xff]   ;;  %v2775_v20 = vld [vmem:[%s3850_s11 + $0x10] sm:$0xff]   ;;  %v2776_v21 = vld [vmem:[%s3850_s11 + $0x8] sm:$0xff]  }
 0x6c1   :  { %v845_v26 = vsel %vm808_vm6, %v843_v27, %v2731_v22  ;;  %v844_v34 = vsel %vm808_vm6, %v842_v28, %v2730_v23  ;;  %v2724_v16 = vpop.permute.xlu1 %2723  ;;  %2578 = vmatprep.subr.bf16.mxu1 %v2774_v19  ;;  %v2777_v22 = vld [vmem:[%s3850_s11] sm:$0xff]  }
 0x6c2   :  { %v849_v35 = vrot.slane %v845_v26, 4  ;;  %v848_v36 = vrot.slane %v844_v34, 4  ;;  %v2726_v37 = vunpack.i.h.bf16 %v2724_v16  ;;  %v2725_v38 = vunpack.i.l.bf16 %v2724_v16  ;;  %2579 = vmatpush3.bf16.msra.mxu1 %v2774_v19 }
 0x6c3   :  { %2580 = vmatprep.subr.bf16.mxu1 %v2775_v20 }
 0x6c4   :  { %v806_v44 = vsel %vm76_vm0, %v804_v39, %v2726_v37  ;;  %v807_v41 = vsel %vm76_vm0, %v805_v40, %v2725_v38  ;;  %v850_v46 = vsel %vm124_vm2, %v848_v36, %v849_v35 }
 0x6c5   :  { %v810_v49 = vsel %vm808_vm6, %v807_v41, %v2735_v43  ;;  %v809_v50 = vsel %vm808_vm6, %v806_v44, %v2736_v42  ;;  %v855_v52 = vpack.c.bf16 %v850_v46, %v850_v46 }
 0x6c6   :  { %v853_v51 = vsel %vm124_vm2, %v810_v49, %v848_v36  ;;  %2581 = vmatpush3.bf16.msra.mxu1 %v2775_v20 }
 0x6c7   :  { %v854_v47 = vpack.c.bf16 %v853_v51, %v809_v50  ;;  %2582 = vmatprep.subr.bf16.mxu1 %v2776_v21 }
 0x6c9   :  { %2566 = vmatprep.mubr.msk.bf16.mxu0 %vm204_vm3, %v854_v47 }
 0x6ca   :  { %2567 = vmatmul.mubr.msk.bf16.vlgmr.msra.gmra.mxu0 %vm204_vm3, %v855_v52  ;;  %2583 = vmatpush3.bf16.msra.mxu1 %v2776_v21 }
 0x6cb   :  { %2584 = vmatprep.subr.bf16.mxu1 %v2777_v22 }
 0x6ce   :  { %2585 = vmatpush3.bf16.msra.mxu1 %v2777_v22 }
 0x78a   :  { %v2568_v45 = vpop.f32.mrf.mxu0 }
 0x78b   :  { %v3418_v57 = vadd.f32 %v2568_v45, %v3145_v31  ;;  %v2772_v31 = vld [vmem:[%s3849_s10 + $0x8] sm:$0xff]  }
 0x78c   :  { %v912_v48 = vpop.f32.mrf.mxu0  ;;  %2570 = vmatprep.subr.bf16.mxu0 %v2772_v31 }
 0x78d   :  { %v3413_v53 = vadd.f32 %v912_v48, %v3139_v25  ;;  %v931_v61 = vmul.f32 %v3418_v57, %v3418_v57  ;;  %2571 = vmatpush3.bf16.msra.mxu0 %v2772_v31 }
 0x78e   :  { %v2569_v54 = vpop.f32.mrf.mxu0 }
 0x78f   :  { %v929_v55 = vmul.f32 %v3413_v53, %v3413_v53  ;;  %v938_v62 = vsel %vm204_vm3, %v931_v61, 0.0 }
 0x790   :  { %v915_v56 = vpop.f32.mrf.mxu0 }
 0x791   :  { %v3421_v58 = vadd.f32 %v915_v56, %v3148_v32  ;;  %v932_v59 = vsel %vm204_vm3, %v929_v55, 0.0  ;;  %v2773_v32 = vld [vmem:[%s3849_s10] sm:$0xff]  }
 0x792   :  { %933 = vadd.xlane.f32.xlu1 %v932_v59  ;;  %2572 = vmatprep.subr.bf16.mxu0 %v2773_v32 }
 0x793   :  { %v930_v60 = vmul.f32 %v3421_v58, %v3421_v58  ;;  %2573 = vmatpush3.bf16.msra.mxu0 %v2773_v32 }
 0x795   :  { %v935_v25 = vsel %vm204_vm3, %v930_v60, 0.0 }
 0x796   :  { %936 = vadd.xlane.f32.xlu0 %v935_v25 }
 0x79a   :  { %939 = vadd.xlane.f32.xlu0 %v938_v62 }
 0x81b   :  { %v934_v63 = vpop.xlane.xlu1 %933 }
 0x81c   :  { %v941_v0 = vmul.f32 0.03125, %v934_v63 }
 0x81e   :  { %v944_v2 = vadd.f32 1e-05, %v941_v0 }
 0x81f   :  { %v937_v4 = vpop.xlane.xlu0 %936 }
 0x820   :  { %2844 = vrsqrt.f32 %v944_v2  ;;  %v942_v24 = vmul.f32 0.03125, %v937_v4 }
 0x822   :  { %v945_v5 = vadd.f32 1e-05, %v942_v24 }
 0x823   :  { %v940_v7 = vpop.xlane.xlu0 %939 }
 0x824   :  { %2846 = vrsqrt.f32 %v945_v5  ;;  %v943_v30 = vmul.f32 0.03125, %v940_v7 }
 0x826   :  { %v946_v14 = vadd.f32 1e-05, %v943_v30 }
 0x828   :  { %2848 = vrsqrt.f32 %v946_v14 }
 0x82d   :  { %v2845_v33 = vpop.eup %2844 }
 0x82e   :  { %v950_v8 = vmul.f32 %v2845_v33, %v3413_v53 }
 0x830   :  { %v960_v11 = vmul.f32 %v2326_v9, %v950_v8 }
 0x831   :  { %v2847_v3 = vpop.eup %2846 }
 0x832   :  { %v951_v6 = vmul.f32 %v2847_v3, %v3421_v58 }
 0x834   :  { %v961_v12 = vmul.f32 %v2326_v9, %v951_v6 }
 0x835   :  { %v2849_v13 = vpop.eup %2848 }
 0x836   :  { %v963_v10 = vpack.c.bf16 %v961_v12, %v960_v11  ;;  %v952_v17 = vmul.f32 %v2849_v13, %v3418_v57  ;;  %v2341_v13 = vld [vmem:[%s3845_s6 + $0x1] ss:$0 sm:$0xff] }
 0x838   :  { %2574 = vmatprep.mubr.msk.bf16.mxu0 %vm204_vm3, %v963_v10  ;;  %v962_v15 = vmul.f32 %v2326_v9, %v952_v17 }
 0x83a   :  { %v964_v18 = vpack.c.bf16 %v962_v15, %v962_v15 }
 0x83c   :  { %2575 = vmatmul.mubr.msk.bf16.vlgmr.msra.gmra.mxu0 %vm204_vm3, %v964_v18 }
 0x8fc   :  { %v2576_v23 = vpop.f32.mrf.mxu0 }
 0x8fd   :  { %v2333_v16 = vmul.f32 -1.442695, %v2576_v23 }
 0x8fe   :  { %v1021_v27 = vpop.f32.mrf.mxu0 }
 0x8ff   :  { %1059 = vrot.lane.b32.xlu0 %v1021_v27, %s3008_s19  ;;  %v2331_v26 = vmul.f32 -1.442695, %v1021_v27 }
 0x900   :  { %v2577_v28 = vpop.f32.mrf.mxu0 }
 0x901   :  { %2850 = vpow2.f32 %v2331_v26 }
 0x902   :  { %v1024_v29 = vpop.f32.mrf.mxu0 }
 0x903   :  { %1061 = vrot.lane.b32.xlu1 %v1024_v29, %s3008_s19  ;;  %v2332_v34 = vmul.f32 -1.442695, %v1024_v29 }
 0x905   :  { %2852 = vpow2.f32 %v2332_v34 }
 0x906   :  { %2854 = vpow2.f32 %v2333_v16 }
 0x907   :  { %1063 = vrot.lane.b32.xlu1 %v2576_v23, %s3008_s19 }
 0x90e   :  { %v2851_v35 = vpop.eup %2850 }
 0x90f   :  { %v1044_v37 = vadd.f32 1.0, %v2851_v35 }
 0x911   :  { %2856 = vrcp.f32 %v1044_v37 }
 0x912   :  { %v2853_v36 = vpop.eup %2852 }
 0x913   :  { %v1045_v38 = vadd.f32 1.0, %v2853_v36  ;;  %v2855_v39 = vpop.eup %2854 }
 0x914   :  { %v1046_v40 = vadd.f32 1.0, %v2855_v39 }
 0x915   :  { %2858 = vrcp.f32 %v1045_v38 }
 0x916   :  { %2860 = vrcp.f32 %v1046_v40 }
 0x91e   :  { %v2857_v42 = vpop.eup %2856 }
 0x91f   :  { %v1053_v41 = vmul.f32 %v2857_v42, %v1021_v27 }
 0x922   :  { %v2859_v43 = vpop.eup %2858 }
 0x923   :  { %v1054_v46 = vmul.f32 %v2859_v43, %v1024_v29  ;;  %v2861_v49 = vpop.eup %2860 }
 0x924   :  { %v1055_v45 = vmul.f32 %v2861_v49, %v2576_v23 }
 0x971   :  { %v1060_v44 = vpop.permute.xlu0 %1059 }
 0x972   :  { %v1068_v51 = vmul.f32 %v1060_v44, %v1053_v41 }
 0x975   :  { %v1062_v50 = vpop.permute.xlu1 %1061 }
 0x976   :  { %v1069_v47 = vmul.f32 %v1062_v50, %v1054_v46 }
 0x978   :  { %v1071_v52 = vpack.c.bf16 %v1069_v47, %v1068_v51 }
 0x979   :  { %v1064_v48 = vpop.permute.xlu1 %1063 }
 0x97a   :  { %v1070_v54 = vmul.f32 %v1064_v48, %v1055_v45  ;;  %2586 = vmatprep.mubr.msk.bf16.mxu1 %vm1105_vm7, %v1071_v52 }
 0x97c   :  { %v1072_v55 = vpack.c.bf16 %v1070_v54, %v1070_v54 }
 0x97e   :  { %2587 = vmatmul.mubr.msk.bf16.vlgmr.msra.gmra.mxu1 %vm1105_vm7, %v1072_v55 }
 0xa3e   :  { %v2588_v56 = vpop.f32.mrf.mxu1 }
 0xa3f   :  { %v3467_v31 = vadd.f32 %v2588_v56, %v3418_v57  ;;  %v2778_v57 = vld [vmem:[%s3846_s7 + $0x18] sm:$0xff]  }
 0xa40   :  { %v1146_v59 = vpop.f32.mrf.mxu1  ;;  %2590 = vmatprep.subr.bf16.mxu0 %v2778_v57 }
 0xa41   :  { %v3462_v60 = vadd.f32 %v1146_v59, %v3413_v53  ;;  %v1165_v2 = vmul.f32 %v3467_v31, %v3467_v31  ;;  %2591 = vmatpush3.bf16.msra.mxu0 %v2778_v57 }
 0xa42   :  { %v2589_v25 = vpop.f32.mrf.mxu1 }
 0xa43   :  { %v1163_v61 = vmul.f32 %v3462_v60, %v3462_v60  ;;  %v1172_v4 = vsel %vm204_vm3, %v1165_v2, 0.0 }
 0xa44   :  { %v1149_v62 = vpop.f32.mrf.mxu1 }
 0xa45   :  { %v3470_v32 = vadd.f32 %v1149_v62, %v3421_v58  ;;  %v1166_v63 = vsel %vm204_vm3, %v1163_v61, 0.0  ;;  %v2779_v58 = vld [vmem:[%s3846_s7 + $0x10] sm:$0xff]  }
 0xa46   :  { %1167 = vadd.xlane.f32.xlu1 %v1166_v63  ;;  %2592 = vmatprep.subr.bf16.mxu0 %v2779_v58 }
 0xa47   :  { %v1164_v0 = vmul.f32 %v3470_v32, %v3470_v32  ;;  %2593 = vmatpush3.bf16.msra.mxu0 %v2779_v58 }
 0xa49   :  { %v1169_v53 = vsel %vm204_vm3, %v1164_v0, 0.0 }
 0xa4a   :  { %1170 = vadd.xlane.f32.xlu0 %v1169_v53 }
 0xa4e   :  { %1173 = vadd.xlane.f32.xlu0 %v1172_v4 }
 0xacf   :  { %v1168_v24 = vpop.xlane.xlu1 %1167 }
 0xad0   :  { %v1175_v5 = vmul.f32 0.03125, %v1168_v24 }
 0xad2   :  { %v1178_v7 = vadd.f32 1e-05, %v1175_v5 }
 0xad3   :  { %v1171_v30 = vpop.xlane.xlu0 %1170 }
 0xad4   :  { %2862 = vrsqrt.f32 %v1178_v7  ;;  %v1176_v14 = vmul.f32 0.03125, %v1171_v30 }
 0xad6   :  { %v1179_v33 = vadd.f32 1e-05, %v1176_v14 }
 0xad7   :  { %v1174_v8 = vpop.xlane.xlu0 %1173 }
 0xad8   :  { %2864 = vrsqrt.f32 %v1179_v33  ;;  %v1177_v3 = vmul.f32 0.03125, %v1174_v8 }
 0xada   :  { %v1180_v9 = vadd.f32 1e-05, %v1177_v3 }
 0xadc   :  { %2866 = vrsqrt.f32 %v1180_v9 }
 0xae1   :  { %v2863_v6 = vpop.eup %2862 }
 0xae2   :  { %v1184_v11 = vmul.f32 %v2863_v6, %v3462_v60 }
 0xae4   :  { %v1195_v17 = vmul.f32 %v2341_v13, %v1184_v11 }
 0xae5   :  { %v2865_v12 = vpop.eup %2864 }
 0xae6   :  { %v1185_v10 = vmul.f32 %v2865_v12, %v3470_v32 }
 0xae8   :  { %v1196_v15 = vmul.f32 %v2341_v13, %v1185_v10 }
 0xae9   :  { %v2867_v18 = vpop.eup %2866 }
 0xaea   :  { %v1198_v19 = vpack.c.bf16 %v1196_v15, %v1195_v17  ;;  %v1186_v20 = vmul.f32 %v2867_v18, %v3467_v31 }
 0xaec   :  { %2594 = vmatprep.mubr.msk.bf16.mxu0 %vm204_vm3, %v1198_v19  ;;  %v1197_v21 = vmul.f32 %v2341_v13, %v1186_v20 }
 0xaee   :  { %v1199_v22 = vpack.c.bf16 %v1197_v21, %v1197_v21 }
 0xaf0   :  { %2595 = vmatmul.mubr.msk.bf16.vlgmr.msra.gmra.mxu0 %vm204_vm3, %v1199_v22 }
 0xbb0   :  { %v2596_v23 = vpop.f32.mrf.mxu0 }
 0xbb1   :  { %v1295_v27 = vrot.slane %v2596_v23, 4 }
 0xbb2   :  { %v1257_v28 = vpop.f32.mrf.mxu0 }
 0xbb3   :  { %1307 = vrot.lane.b32.xlu0 %v1295_v27, %s3004_s0  ;;  %v1273_v35 = vrot.slane %v1257_v28, 4  ;;  %v1321_v24 = vmul.f32 0.35355338, %v1257_v28 }
 0xbb4   :  { %v2597_v29 = vpop.f32.mrf.mxu0 }
 0xbb6   :  { %v1260_v26 = vpop.f32.mrf.mxu0 }
 0xbb7   :  { %1311 = vrot.lane.b32.xlu1 %v1260_v26, %s3005_s2  ;;  %v1274_v34 = vrot.slane %v1260_v26, 4 }
 0xbb9   :  { %v3496_v16 = vsel %vm124_vm2, %v1274_v34, %v1295_v27  ;;  %v1275_v36 = vsel %vm124_vm2, %v1273_v35, %v1274_v34 }
 0xbba   :  { %1305 = vrot.lane.b32.xlu0 %v3496_v16, %s3004_s0 }
 0xbbb   :  { %1313 = vrot.lane.b32.xlu1 %v2596_v23, %s3005_s2 }
 0xbbe   :  { %1284 = vrot.lane.b32.xlu0 %v1260_v26, %s3004_s0 }
 0xbbf   :  { %1301 = vrot.lane.b32.xlu1 %v2596_v23, %s3006_s30 }
 0xbc2   :  { %1290 = vrot.lane.b32.xlu0 %v1275_v36, %s3005_s2 }
 0xbc3   :  { %1299 = vrot.lane.b32.xlu1 %v1260_v26, %s3006_s30 }
 0xbc6   :  { %1282 = vrot.lane.b32.xlu0 %v1257_v28, %s3004_s0 }
 0xbc7   :  { %1288 = vrot.lane.b32.xlu1 %v1273_v35, %s3005_s2 }
 0xbcb   :  { %1278 = vrot.lane.b32.xlu1 %v1275_v36, %s3006_s30 }
 0xbcf   :  { %1276 = vrot.lane.b32.xlu1 %v1273_v35, %s3006_s30  ;;  %v2947_v35 = vld [vmem:[%s3844_s5] sm:$0xff] }
 0xc25   :  { %v1308_v37 = vpop.permute.xlu0 %1307 }
 0xc29   :  { %v1312_v38 = vpop.permute.xlu1 %1311 }
 0xc2a   :  { %v1320_v39 = vsel %vm124_vm2, %v1308_v37, %v1312_v38 }
 0xc2b   :  { %v3511_v43 = vmul.f32 0.35355338, %v1320_v39 }
 0xc2c   :  { %v1306_v40 = vpop.permute.xlu0 %1305 }
 0xc2d   :  { %v1314_v42 = vpop.permute.xlu1 %1313  ;;  %v3518_v51 = vmul.f32 0.35355338, %v1306_v40 }
 0xc2e   :  { %v3513_v44 = vmul.f32 0.35355338, %v1314_v42  ;;  %v1344_v41 = vpack.c.bf16 %v1314_v42, %v1320_v39 }
 0xc30   :  { %v1338_v46 = vpack.c.bf16 %v3513_v44, %v3511_v43  ;;  %1361 = vrot.lane.b32.xlu0 %v1344_v41, %s3007_s18  ;;  %v1285_v49 = vpop.permute.xlu0 %1284  ;;  %v2949_v43 = vld [vmem:[%s3844_s5 + $0x8] sm:$0xff] }
 0xc31   :  { %v1302_v50 = vpop.permute.xlu1 %1301 }
 0xc32   :  { %v3520_v47 = vmul.f32 0.35355338, %v1302_v50  ;;  %v1343_v52 = vpack.c.bf16 %v1306_v40, %v1302_v50  ;;  %v2948_v40 = vld [vmem:[%s3844_s5 + $0x18] sm:$0xff] }
 0xc34   :  { %v1337_v45 = vpack.c.bf16 %v3518_v51, %v3520_v47  ;;  %1359 = vrot.lane.b32.xlu1 %v1343_v52, %s3007_s18  ;;  %v1291_v55 = vpop.permute.xlu0 %1290  ;;  %v2950_v51 = vld [vmem:[%s3844_s5 + $0x30] sm:$0xff] }
 0xc35   :  { %v1300_v48 = vpop.permute.xlu1 %1299  ;;  %v1326_v61 = vmul.f32 0.35355338, %v1291_v55 }
 0xc36   :  { %v1319_v54 = vsel %vm124_vm2, %v1295_v27, %v1300_v48  ;;  %v1327_v27 = vmul.f32 0.35355338, %v3496_v16  ;;  %v2951_v48 = vld [vmem:[%s3844_s5 + $0x38] sm:$0xff] }
 0xc37   :  { %v3527_v56 = vpack.c.bf16 %v1319_v54, %v3496_v16  ;;  %v1328_v23 = vmul.f32 0.35355338, %v1319_v54 }
 0xc38   :  { %v1283_v0 = vpop.permute.xlu0 %1282 }
 0xc39   :  { %v1289_v59 = vpop.permute.xlu1 %1288  ;;  %1357 = vrot.lane.b32.xlu0 %v3527_v56, %s3007_s18  ;;  %v1324_v21 = vmul.f32 0.35355338, %v1283_v0 }
 0xc3a   :  { %v1318_v25 = vsel %vm124_vm2, %v1285_v49, %v1289_v59  ;;  %v2952_v59 = vld [vmem:[%s3844_s5 + $0x20] sm:$0xff] }
 0xc3b   :  { %v1325_v62 = vmul.f32 0.35355338, %v1318_v25  ;;  %v3532_v63 = vpack.c.bf16 %v1291_v55, %v1318_v25 }
 0xc3d   :  { %v1335_v53 = vpack.c.bf16 %v1326_v61, %v1325_v62  ;;  %v1279_v2 = vpop.permute.xlu1 %1278  ;;  %1355 = vrot.lane.b32.xlu1 %v3532_v63, %s3007_s18  ;;  %v2953_v61 = vld [vmem:[%s3844_s5 + $0x28] sm:$0xff] }
 0xc3e   :  { %v3536_v4 = vpack.c.bf16 %v1283_v0, %v1279_v2  ;;  %v1323_v20 = vmul.f32 0.35355338, %v1279_v2 }
 0xc40   :  { %1353 = vrot.lane.b32.xlu0 %v3536_v4, %s3007_s18  ;;  %v1334_v22 = vpack.c.bf16 %v1324_v21, %v1323_v20 }
 0xc41   :  { %v1277_v57 = vpop.permute.xlu1 %1276 }
 0xc42   :  { %v1317_v58 = vsel %vm124_vm2, %v1260_v26, %v1277_v57  ;;  %v2946_v26 = vld [vmem:[%s3844_s5 + $0x10] sm:$0xff] }
 0xc43   :  { %v1322_v5 = vmul.f32 0.35355338, %v1317_v58  ;;  %v3541_v7 = vpack.c.bf16 %v1317_v58, %v1257_v28  ;;  %v1336_v28 = vpack.c.bf16 %v1328_v23, %v1327_v27  ;;  %v2954_v58 = vld [vmem:[%s3844_s5 + $0x50] sm:$0xff] }
 0xc44   :  { %1628 = vrot.lane.b32.xlu0 %v1344_v41, %s3008_s19 }
 0xc45   :  { %v1333_v30 = vpack.c.bf16 %v1322_v5, %v1321_v24  ;;  %1351 = vrot.lane.b32.xlu1 %v3541_v7, %s3007_s18 }
 0xc47   :  { %2610 = vmatprep.mubr.msk.bf16.mxu0 %vm401_vm4, %v1333_v30 }
 0xc49   :  { %1626 = vrot.lane.b32.xlu1 %v1343_v52, %s3008_s19 }
 0xca2   :  { %v1362_v14 = vpop.permute.xlu0 %1361 }
 0xca3   :  { %v1397_v33 = vsel %vm401_vm4, %v1362_v14, 0  ;;  %2688 = vmatprep.subr.msk.bf16.mxu0 %vm401_vm4, %v1362_v14 }
 0xca4   :  { %2599 = vmatpush3.bf16.xpose.msra.mxu0 %v1397_v33  ;;  %v2955_v33 = vld [vmem:[%s3844_s5 + $0x58] sm:$0xff] }
 0xca6   :  { %v1360_v8 = vpop.permute.xlu1 %1359 }
 0xca7   :  { %2689 = vmatprep.subr.msk.bf16.mxu0 %vm401_vm4, %v1360_v8  ;;  %v1394_v3 = vsel %vm401_vm4, %v1360_v8, 0 }
 0xcab   :  { %v1358_v9 = vpop.permute.xlu0 %1357 }
 0xcac   :  { %2601 = vmatpush3.bf16.xpose.msra.mxu0 %v1394_v3  ;;  %v1391_v11 = vsel %vm401_vm4, %v1358_v9, 0 }
 0xcad   :  { %2690 = vmatprep.subr.msk.bf16.mxu0 %vm401_vm4, %v1358_v9  ;;  %v2956_v9 = vld [vmem:[%s3844_s5 + $0x40] sm:$0xff] }
 0xcaf   :  { %v1356_v12 = vpop.permute.xlu1 %1355 }
 0xcb0   :  { %v1388_v17 = vsel %vm401_vm4, %v1356_v12, 0 }
 0xcb2   :  { %v1354_v6 = vpop.permute.xlu0 %1353 }
 0xcb3   :  { %v1385_v18 = vsel %vm401_vm4, %v1354_v6, 0 }
 0xcb4   :  { %2603 = vmatpush3.bf16.xpose.msra.mxu0 %v1391_v11  ;;  %v2957_v11 = vld [vmem:[%s3844_s5 + $0x48] sm:$0xff] }
 0xcb5   :  { %2691 = vmatprep.subr.msk.bf16.mxu0 %vm401_vm4, %v1356_v12 }
 0xcb6   :  { %v1629_v13 = vpop.permute.xlu0 %1628 }
 0xcb7   :  { %v1352_v10 = vpop.permute.xlu1 %1351  ;;  %2622 = vmatprep.subr.bf16.mxu1 %v1629_v13 }
 0xcb8   :  { %2623 = vmatpush3.bf16.msra.mxu1 %v1629_v13  ;;  %v1382_v19 = vsel %vm401_vm4, %v1352_v10, 0 }
 0xcbb   :  { %v1627_v15 = vpop.permute.xlu1 %1626 }
 0xcbc   :  { %2605 = vmatpush3.bf16.xpose.msra.mxu0 %v1388_v17  ;;  %2624 = vmatprep.subr.bf16.mxu1 %v1627_v15 }
 0xcbd   :  { %2692 = vmatprep.subr.msk.bf16.mxu0 %vm401_vm4, %v1354_v6  ;;  %2625 = vmatpush3.bf16.msra.mxu1 %v1627_v15 }
 0xcc4   :  { %2607 = vmatpush3.bf16.xpose.msra.mxu0 %v1385_v18 }
 0xcc5   :  { %2693 = vmatprep.subr.msk.bf16.mxu0 %vm401_vm4, %v1352_v10 }
 0xccc   :  { %2609 = vmatpush3.bf16.xpose.msra.mxu0 %v1382_v19 }
 0xcd3   :  { %2611 = vmatmul.mubr.msk.bf16.vlgmr.msra.gmra.mxu0 %vm401_vm4, %v1334_v22 }
 0xcd4   :  { %2614 = vmatprep.mubr.msk.bf16.mxu0 %vm401_vm4, %v1335_v53 }
 0xcdb   :  { %2615 = vmatmul.mubr.msk.bf16.gmra.mxu0 %vm401_vm4, %v1336_v28 }
 0xcdc   :  { %2618 = vmatprep.mubr.msk.bf16.mxu0 %vm401_vm4, %v1337_v45 }
 0xce3   :  { %2619 = vmatmul.mubr.msk.bf16.gmra.mxu0 %vm401_vm4, %v1338_v46 }
 0xd93   :  { %v2612_v29 = vpop.f32.mrf.mxu0 }
 0xd94   :  { %v1442_v34 = vadd.f32 %v2946_v26, %v2612_v29 }
 0xd95   :  { %v1433_v16 = vpop.f32.mrf.mxu0 }
 0xd96   :  { %v3578_v36 = vadd.f32 %v2947_v35, %v1433_v16  ;;  %v1486_v37 = vsel %vm519_vm5, %v1442_v34, -inf }
 0xd97   :  { %1487 = vmax.xlane.f32.xlu0 %v1486_v37  ;;  %v2613_v38 = vpop.f32.mrf.mxu0 }
 0xd98   :  { %v3584_v42 = vadd.f32 %v2948_v40, %v2613_v38  ;;  %v1480_v41 = vsel %vm519_vm5, %v3578_v36, -inf }
 0xd99   :  { %v1436_v39 = vpop.f32.mrf.mxu0 }
 0xd9a   :  { %v1437_v44 = vadd.f32 %v2949_v43, %v1436_v39  ;;  %v1489_v52 = vsel %vm519_vm5, %v3584_v42, -inf }
 0xd9b   :  { %v2616_v46 = vpop.f32.mrf.mxu0  ;;  %1481 = vmax.xlane.f32.xlu0 %v1480_v41 }
 0xd9c   :  { %v1483_v49 = vsel %vm519_vm5, %v1437_v44, -inf  ;;  %v1458_v47 = vadd.f32 %v2950_v51, %v2616_v46 }
 0xd9d   :  { %v1449_v50 = vpop.f32.mrf.mxu0  ;;  %1484 = vmax.xlane.f32.xlu1 %v1483_v49 }
 0xd9e   :  { %v1450_v25 = vadd.f32 %v2952_v59, %v1449_v50  ;;  %v1498_v53 = vsel %vm519_vm5, %v1458_v47, -inf }
 0xd9f   :  { %v2617_v45 = vpop.f32.mrf.mxu0  ;;  %1490 = vmax.xlane.f32.xlu0 %v1489_v52 }
 0xda0   :  { %v3600_v54 = vadd.f32 %v2951_v48, %v2617_v45  ;;  %v1492_v30 = vsel %vm519_vm5, %v1450_v25, -inf }
 0xda1   :  { %v1452_v55 = vpop.f32.mrf.mxu0 }
 0xda2   :  { %v3608_v62 = vadd.f32 %v2953_v61, %v1452_v55  ;;  %v1501_v0 = vsel %vm519_vm5, %v3600_v54, -inf }
 0xda3   :  { %v2620_v2 = vpop.f32.mrf.mxu0  ;;  %1502 = vmax.xlane.f32.xlu1 %v1501_v0  ;;  %1499 = vmax.xlane.f32.xlu0 %v1498_v53 }
 0xda4   :  { %v1474_v24 = vadd.f32 %v2954_v58, %v2620_v2  ;;  %v1495_v5 = vsel %vm519_vm5, %v3608_v62, -inf }
 0xda5   :  { %v1465_v57 = vpop.f32.mrf.mxu0 }
 0xda6   :  { %v1466_v6 = vadd.f32 %v2956_v9, %v1465_v57  ;;  %v1510_v10 = vsel %vm519_vm5, %v1474_v24, -inf }
 0xda7   :  { %v2621_v14 = vpop.f32.mrf.mxu0  ;;  %1496 = vmax.xlane.f32.xlu1 %v1495_v5  ;;  %1493 = vmax.xlane.f32.xlu0 %v1492_v30 }
 0xda8   :  { %v3622_v8 = vadd.f32 %v2955_v33, %v2621_v14  ;;  %v1504_v15 = vsel %vm519_vm5, %v1466_v6, -inf }
 0xda9   :  { %v1468_v3 = vpop.f32.mrf.mxu0 }
 0xdaa   :  { %v3630_v12 = vadd.f32 %v2957_v11, %v1468_v3  ;;  %v1513_v13 = vsel %vm519_vm5, %v3622_v8, -inf }
 0xdab   :  { %1514 = vmax.xlane.f32.xlu1 %v1513_v13  ;;  %1511 = vmax.xlane.f32.xlu0 %v1510_v10 }
 0xdac   :  { %v1507_v17 = vsel %vm519_vm5, %v3630_v12, -inf }
 0xdaf   :  { %1508 = vmax.xlane.f32.xlu1 %v1507_v17  ;;  %1505 = vmax.xlane.f32.xlu0 %v1504_v15 }
 0xdc5   :  { %1624 = vrot.lane.b32.xlu0 %v3527_v56, %s3008_s19 }
 0xe20   :  { %v1488_v18 = vpop.xlane.xlu0 %1487 }
 0xe21   :  { %v1518_v19 = vsub.f32 %v1442_v34, %v1488_v18 }
 0xe23   :  { %v1532_v20 = vmul.f32 1.442695, %v1518_v19 }
 0xe24   :  { %v1482_v21 = vpop.xlane.xlu0 %1481 }
 0xe25   :  { %2868 = vpow2.f32 %v1532_v20  ;;  %v1516_v22 = vsub.f32 %v3578_v36, %v1482_v21 }
 0xe26   :  { %v1485_v23 = vpop.xlane.xlu1 %1484 }
 0xe27   :  { %v1528_v27 = vmul.f32 1.442695, %v1516_v22  ;;  %v1517_v28 = vsub.f32 %v1437_v44, %v1485_v23 }
 0xe28   :  { %v1491_v29 = vpop.xlane.xlu0 %1490 }
 0xe29   :  { %2870 = vpow2.f32 %v1528_v27  ;;  %v1519_v26 = vsub.f32 %v3584_v42, %v1491_v29  ;;  %v1530_v16 = vmul.f32 1.442695, %v1517_v28 }
 0xe2b   :  { %v1534_v35 = vmul.f32 1.442695, %v1519_v26 }
 0xe2c   :  { %v1503_v37 = vpop.xlane.xlu1 %1502  ;;  %v1500_v38 = vpop.xlane.xlu0 %1499 }
 0xe2d   :  { %2872 = vpow2.f32 %v1534_v35  ;;  %v1522_v56 = vsub.f32 %v1458_v47, %v1500_v38  ;;  %v1523_v36 = vsub.f32 %v3600_v54, %v1503_v37 }
 0xe2e   :  { %2874 = vpow2.f32 %v1530_v16 }
 0xe2f   :  { %v1540_v34 = vmul.f32 1.442695, %v1522_v56  ;;  %v1542_v47 = vmul.f32 1.442695, %v1523_v36 }
 0xe30   :  { %v1497_v39 = vpop.xlane.xlu1 %1496  ;;  %v1494_v40 = vpop.xlane.xlu0 %1493 }
 0xe31   :  { %v1520_v43 = vsub.f32 %v1450_v25, %v1494_v40  ;;  %2876 = vpow2.f32 %v1540_v34  ;;  %v1521_v52 = vsub.f32 %v3608_v62, %v1497_v39 }
 0xe32   :  { %v3642_v41 = vpop.eup %2868 }
 0xe33   :  { %v1536_v44 = vmul.f32 1.442695, %v1520_v43  ;;  %v1558_v42 = vsel %vm519_vm5, %v3642_v41, 0.0  ;;  %v1538_v61 = vmul.f32 1.442695, %v1521_v52 }
 0xe34   :  { %1559 = vadd.xlane.f32.xlu0 %v1558_v42  ;;  %v1512_v46 = vpop.xlane.xlu0 %1511  ;;  %v1515_v49 = vpop.xlane.xlu1 %1514 }
 0xe35   :  { %v1526_v50 = vsub.f32 %v1474_v24, %v1512_v46  ;;  %2878 = vpow2.f32 %v1536_v44  ;;  %v1527_v54 = vsub.f32 %v3622_v8, %v1515_v49 }
 0xe36   :  { %v3647_v51 = vpop.eup %2870 }
 0xe37   :  { %v1548_v45 = vmul.f32 1.442695, %v1526_v50  ;;  %v1552_v48 = vsel %vm519_vm5, %v3647_v51, 0.0  ;;  %v1550_v2 = vmul.f32 1.442695, %v1527_v54 }
 0xe38   :  { %1553 = vadd.xlane.f32.xlu0 %v1552_v48  ;;  %v1506_v55 = vpop.xlane.xlu0 %1505  ;;  %v1509_v18 = vpop.xlane.xlu1 %1508 }
 0xe39   :  { %v1524_v59 = vsub.f32 %v1466_v6, %v1506_v55  ;;  %2880 = vpow2.f32 %v1548_v45  ;;  %v1525_v19 = vsub.f32 %v3630_v12, %v1509_v18 }
 0xe3a   :  { %v3653_v25 = vpop.eup %2872  ;;  %2882 = vpow2.f32 %v1542_v47 }
 0xe3b   :  { %v1544_v0 = vmul.f32 1.442695, %v1524_v59  ;;  %v1561_v53 = vsel %vm519_vm5, %v3653_v25, 0.0  ;;  %v2875_v62 = vpop.eup %2874  ;;  %v1546_v20 = vmul.f32 1.442695, %v1525_v19 }
 0xe3c   :  { %1562 = vadd.xlane.f32.xlu1 %v1561_v53  ;;  %v1625_v57 = vpop.permute.xlu0 %1624  ;;  %v1555_v58 = vsel %vm519_vm5, %v2875_v62, 0.0 }
 0xe3d   :  { %2626 = vmatprep.subr.bf16.mxu1 %v1625_v57  ;;  %2884 = vpow2.f32 %v1544_v0 }
 0xe3e   :  { %2627 = vmatpush3.bf16.msra.mxu1 %v1625_v57  ;;  %2886 = vpow2.f32 %v1538_v61  ;;  %v3658_v24 = vpop.eup %2876 }
 0xe3f   :  { %2888 = vpow2.f32 %v1550_v2  ;;  %v1570_v5 = vsel %vm519_vm5, %v3658_v24, 0.0 }
 0xe40   :  { %1556 = vadd.xlane.f32.xlu1 %v1555_v58  ;;  %2890 = vpow2.f32 %v1546_v20 }
 0xe42   :  { %v3662_v30 = vpop.eup %2878 }
 0xe43   :  { %v1564_v33 = vsel %vm519_vm5, %v3662_v30, 0.0 }
 0xe44   :  { %1571 = vadd.xlane.f32.xlu1 %v1570_v5 }
 0xe46   :  { %v3664_v14 = vpop.eup %2880 }
 0xe47   :  { %v3668_v8 = vpop.eup %2882  ;;  %v1582_v3 = vsel %vm519_vm5, %v3664_v14, 0.0 }
 0xe48   :  { %1565 = vadd.xlane.f32.xlu1 %v1564_v33  ;;  %1583 = vadd.xlane.f32.xlu0 %v1582_v3  ;;  %v1573_v6 = vsel %vm519_vm5, %v3668_v8, 0.0  ;;  %v2780_v3 = vld [vmem:[%s3847_s8 + $0x18] sm:$0xff]  }
 0xe4a   :  { %v3672_v9 = vpop.eup %2884 }
 0xe4b   :  { %v2887_v11 = vpop.eup %2886  ;;  %v1576_v13 = vsel %vm519_vm5, %v3672_v9, 0.0 }
 0xe4c   :  { %1574 = vadd.xlane.f32.xlu1 %v1573_v6  ;;  %v3678_v10 = vpop.eup %2888  ;;  %1577 = vadd.xlane.f32.xlu0 %v1576_v13  ;;  %v1567_v17 = vsel %vm519_vm5, %v2887_v11, 0.0 }
 0xe4d   :  { %v1585_v15 = vsel %vm519_vm5, %v3678_v10, 0.0  ;;  %v3688_v21 = vpop.eup %2890 }
 0xe4e   :  { %v1579_v22 = vsel %vm519_vm5, %v3688_v21, 0.0 }
 0xe50   :  { %1568 = vadd.xlane.f32.xlu1 %v1567_v17  ;;  %1586 = vadd.xlane.f32.xlu0 %v1585_v15 }
 0xe61   :  { %1620 = vrot.lane.b32.xlu1 %v3536_v4, %s3008_s19 }
 0xe66   :  { %1622 = vrot.lane.b32.xlu0 %v3532_v63, %s3008_s19 }
 0xe85   :  { %1580 = vadd.xlane.f32.xlu1 %v1579_v22 }
 0xe96   :  { %1618 = vrot.lane.b32.xlu1 %v3541_v7, %s3008_s19 }
 0xebd   :  { %v1560_v23 = vpop.xlane.xlu0 %1559 }
 0xec1   :  { %v1554_v27 = vpop.xlane.xlu0 %1553 }
 0xec2   :  { %2892 = vrcp.f32 %v1554_v27 }
 0xec5   :  { %v1563_v4 = vpop.xlane.xlu1 %1562 }
 0xec9   :  { %v1557_v28 = vpop.xlane.xlu1 %1556 }
 0xeca   :  { %2894 = vrcp.f32 %v1557_v28 }
 0xecb   :  { %2896 = vrcp.f32 %v1563_v4 }
 0xecd   :  { %v1572_v63 = vpop.xlane.xlu1 %1571 }
 0xecf   :  { %v2893_v26 = vpop.eup %2892 }
 0xed0   :  { %v1600_v38 = vmul.f32 %v2893_v26, %v3647_v51 }
 0xed1   :  { %v1566_v29 = vpop.xlane.xlu1 %1565  ;;  %v1584_v12 = vpop.xlane.xlu0 %1583 }
 0xed5   :  { %v1575_v16 = vpop.xlane.xlu1 %1574  ;;  %v1578_v35 = vpop.xlane.xlu0 %1577 }
 0xed7   :  { %v2895_v37 = vpop.eup %2894 }
 0xed8   :  { %v1601_v56 = vmul.f32 %v2895_v37, %v2875_v62  ;;  %v2897_v36 = vpop.eup %2896 }
 0xed9   :  { %v1569_v34 = vpop.xlane.xlu1 %1568  ;;  %v1587_v39 = vpop.xlane.xlu0 %1586  ;;  %v1603_v50 = vmul.f32 %v2897_v36, %v3653_v25 }
 0xeda   :  { %v1612_v40 = vpack.c.bf16 %v1601_v56, %v1600_v38  ;;  %2898 = vrcp.f32 %v1569_v34 }
 0xedb   :  { %2900 = vrcp.f32 %v1560_v23 }
 0xedc   :  { %2634 = vmatprep.mubr.msk.bf16.mxu1 %vm519_vm5, %v1612_v40  ;;  %2902 = vrcp.f32 %v1566_v29 }
 0xedd   :  { %v1623_v7 = vpop.permute.xlu0 %1622  ;;  %v1621_v43 = vpop.permute.xlu1 %1620  ;;  %2904 = vrcp.f32 %v1575_v16 }
 0xede   :  { %2628 = vmatprep.subr.bf16.mxu1 %v1623_v7  ;;  %2906 = vrcp.f32 %v1572_v63 }
 0xedf   :  { %2629 = vmatpush3.bf16.msra.mxu1 %v1623_v7  ;;  %2908 = vrcp.f32 %v1578_v35 }
 0xee0   :  { %2630 = vmatprep.subr.bf16.mxu1 %v1621_v43 }
 0xee3   :  { %2631 = vmatpush3.bf16.msra.mxu1 %v1621_v43 }
 0xee7   :  { %v2899_v42 = vpop.eup %2898 }
 0xee8   :  { %v2901_v46 = vpop.eup %2900  ;;  %v1605_v47 = vmul.f32 %v2899_v42, %v2887_v11 }
 0xee9   :  { %v2903_v49 = vpop.eup %2902  ;;  %v1602_v52 = vmul.f32 %v2901_v46, %v3642_v41 }
 0xeea   :  { %v1604_v45 = vmul.f32 %v2903_v49, %v3662_v30  ;;  %v2905_v54 = vpop.eup %2904 }
 0xeeb   :  { %v1613_v48 = vpack.c.bf16 %v1603_v50, %v1602_v52  ;;  %v2907_v59 = vpop.eup %2906  ;;  %v1607_v61 = vmul.f32 %v2905_v54, %v3668_v8 }
 0xeec   :  { %v1614_v55 = vpack.c.bf16 %v1605_v47, %v1604_v45  ;;  %v2909_v25 = vpop.eup %2908  ;;  %v1606_v0 = vmul.f32 %v2907_v59, %v3658_v24 }
 0xeed   :  { %v1608_v41 = vmul.f32 %v2909_v25, %v3672_v9 }
 0xeee   :  { %v1615_v62 = vpack.c.bf16 %v1607_v61, %v1606_v0 }
 0xf0e   :  { %v1581_v44 = vpop.xlane.xlu1 %1580 }
 0xf0f   :  { %2910 = vrcp.f32 %v1581_v44 }
 0xf10   :  { %2912 = vrcp.f32 %v1587_v39 }
 0xf11   :  { %2914 = vrcp.f32 %v1584_v12 }
 0xf12   :  { %v1619_v51 = vpop.permute.xlu1 %1618 }
 0xf13   :  { %2632 = vmatprep.subr.bf16.mxu1 %v1619_v51 }
 0xf14   :  { %2633 = vmatpush3.bf16.msra.mxu1 %v1619_v51 }
 0xf15   :  { %2646 = vmatprep.subr.bf16.mxu1 %v2780_v3 }
 0xf17   :  { %2635 = vmatmul.mubr.msk.bf16.vlgmr.msra.gmra.mxu1 %vm519_vm5, %v1613_v48 }
 0xf18   :  { %2638 = vmatprep.mubr.msk.bf16.mxu1 %vm519_vm5, %v1614_v55  ;;  %2647 = vmatpush3.bf16.msra.mxu1 %v2780_v3 }
 0xf1c   :  { %v2911_v53 = vpop.eup %2910 }
 0xf1d   :  { %v1609_v2 = vmul.f32 %v2911_v53, %v3688_v21  ;;  %v2913_v57 = vpop.eup %2912  ;;  %v2781_v21 = vld [vmem:[%s3847_s8 + $0x10] sm:$0xff]  }
 0xf1e   :  { %v2915_v5 = vpop.eup %2914  ;;  %v1611_v30 = vmul.f32 %v2913_v57, %v3678_v10  ;;  %2648 = vmatprep.subr.bf16.mxu1 %v2781_v21 }
 0xf1f   :  { %2639 = vmatmul.mubr.msk.bf16.gmra.mxu1 %vm519_vm5, %v1615_v62  ;;  %v1616_v58 = vpack.c.bf16 %v1609_v2, %v1608_v41  ;;  %v1610_v33 = vmul.f32 %v2915_v5, %v3664_v14 }
 0xf20   :  { %2649 = vmatpush3.bf16.msra.mxu1 %v2781_v21 }
 0xf21   :  { %2642 = vmatprep.mubr.msk.bf16.mxu1 %vm519_vm5, %v1616_v58  ;;  %v1617_v8 = vpack.c.bf16 %v1611_v30, %v1610_v33 }
 0xf27   :  { %2643 = vmatmul.mubr.msk.bf16.gmra.mxu1 %vm519_vm5, %v1617_v8 }
 0xfd7   :  { %v2636_v24 = vpop.f32.mrf.mxu1 }
 0xfd8   :  { %v1738_v13 = vrot.slane %v2636_v24, 4 }
 0xfd9   :  { %v3713_v9 = vpop.f32.mrf.mxu1 }
 0xfdb   :  { %v2637_v6 = vpop.f32.mrf.mxu1 }
 0xfdd   :  { %v1691_v11 = vpop.f32.mrf.mxu1 }
 0xfde   :  { %v1737_v17 = vrot.slane %v1691_v11, 4 }
 0xfdf   :  { %v2640_v15 = vpop.f32.mrf.mxu1 }
 0xfe0   :  { %v1739_v10 = vsel %vm124_vm2, %v1737_v17, %v1738_v13 }
 0xfe1   :  { %v2737_v14 = vpack.i.bf16 %v1739_v10, %v1738_v13  ;;  %v1704_v18 = vpop.f32.mrf.mxu1 }
 0xfe2   :  { %v2747_v56 = vpack.i.bf16 %v2637_v6, %v1704_v18  ;;  %v1755_v34 = vrot.slane %v1704_v18, 4 }
 0xfe3   :  { %2738 = vrot.lane.b32.xlu0 %v2737_v14, %s3009_s1  ;;  %v2641_v19 = vpop.f32.mrf.mxu1 }
 0xfe4   :  { %v1772_v27 = vrot.slane %v2641_v19, 4 }
 0xfe5   :  { %v1707_v20 = vpop.f32.mrf.mxu1 }
 0xfe6   :  { %v1756_v37 = vrot.slane %v1707_v20, 4 }
 0xfe7   :  { %v2644_v22 = vpop.f32.mrf.mxu1 }
 0xfe8   :  { %v1790_v12 = vrot.slane %v2644_v22, 4  ;;  %v1757_v40 = vsel %vm124_vm2, %v1755_v34, %v1756_v37 }
 0xfe9   :  { %v1720_v23 = vpop.f32.mrf.mxu1  ;;  %v2762_v7 = vpack.i.bf16 %v1757_v40, %v1756_v37 }
 0xfea   :  { %v1773_v4 = vrot.slane %v1720_v23, 4 }
 0xfeb   :  { %v2645_v28 = vpop.f32.mrf.mxu1 }
 0xfec   :  { %v1774_v63 = vsel %vm124_vm2, %v1772_v27, %v1773_v4  ;;  %v1791_v29 = vrot.slane %v2645_v28, 4 }
 0xfed   :  { %v2742_v26 = vpack.i.bf16 %v1773_v4, %v1774_v63  ;;  %v1723_v16 = vpop.f32.mrf.mxu1  ;;  %v2783_v63 = vld [vmem:[%s3849_s10 + $0x10] sm:$0xff]  }
 0xfee   :  { %v2752_v35 = vpack.i.bf16 %v2644_v22, %v1723_v16  ;;  %v1792_v38 = vsel %vm124_vm2, %v1790_v12, %v1791_v29 }
 0xfef   :  { %2743 = vrot.lane.b32.xlu0 %v2742_v26, %s3009_s1  ;;  %v2757_v39 = vpack.i.bf16 %v1791_v29, %v1792_v38 }
 0xff0   :  { %2753 = vrot.lane.b32.xlu1 %v2752_v35, %s3011_s23 }
 0xff3   :  { %2748 = vrot.lane.b32.xlu0 %v2747_v56, %s3011_s23 }
 0xff4   :  { %2758 = vrot.lane.b32.xlu1 %v2757_v39, %s3010_s22 }
 0xff8   :  { %2763 = vrot.lane.b32.xlu1 %v2762_v7, %s3010_s22 }
0x1055   :  { %v2739_v43 = vpop.permute.xlu0 %2738 }
0x1056   :  { %v2741_v48 = vunpack.i.h.bf16 %v2739_v43  ;;  %v2740_v54 = vunpack.i.l.bf16 %v2739_v43 }
0x1058   :  { %v1764_v5 = vsel %vm401_vm4, %v3713_v9, %v2741_v48  ;;  %v1765_v30 = vsel %vm401_vm4, %v1691_v11, %v2740_v54  ;;  %v2786_v48 = vld [vmem:[%s3850_s11 + $0x28] sm:$0xff]   ;;  %v2787_v54 = vld [vmem:[%s3850_s11 + $0x20] sm:$0xff]  }
0x1061   :  { %v2744_v36 = vpop.permute.xlu0 %2743 }
0x1062   :  { %v2746_v44 = vunpack.i.h.bf16 %v2744_v36  ;;  %v2745_v42 = vunpack.i.l.bf16 %v2744_v36  ;;  %v2754_v46 = vpop.permute.xlu1 %2753  ;;  %v2371_v36 = vld [vmem:[%s3848_s9 + $0x1] ss:$0 sm:$0xff] }
0x1063   :  { %v2756_v49 = vunpack.i.h.bf16 %v2754_v46  ;;  %v2755_v50 = vunpack.i.l.bf16 %v2754_v46 }
0x1064   :  { %v1800_v51 = vsel %vm401_vm4, %v2641_v19, %v2746_v44  ;;  %v1799_v47 = vsel %vm401_vm4, %v2640_v15, %v2745_v42 }
0x1065   :  { %v2749_v52 = vpop.permute.xlu0 %2748  ;;  %v1802_v61 = vsel %vm76_vm0, %v1800_v51, %v2756_v49  ;;  %v1801_v25 = vsel %vm76_vm0, %v1799_v47, %v2755_v50 }
0x1066   :  { %v2759_v45 = vpop.permute.xlu1 %2758  ;;  %v2751_v0 = vunpack.i.h.bf16 %v2749_v52  ;;  %v2750_v53 = vunpack.i.l.bf16 %v2749_v52  ;;  %v2784_v52 = vld [vmem:[%s3850_s11 + $0x38] sm:$0xff]  }
0x1067   :  { %v2761_v55 = vunpack.i.h.bf16 %v2759_v45  ;;  %v2760_v59 = vunpack.i.l.bf16 %v2759_v45  ;;  %v2785_v45 = vld [vmem:[%s3850_s11 + $0x30] sm:$0xff]   ;;  %2662 = vmatprep.subr.bf16.mxu0 %v2784_v52 }
0x1068   :  { %v1766_v24 = vsel %vm76_vm0, %v1764_v5, %v2751_v0  ;;  %v1767_v3 = vsel %vm76_vm0, %v1765_v30, %v2750_v53  ;;  %2663 = vmatpush3.bf16.msra.mxu0 %v2784_v52 }
0x1069   :  { %v1803_v62 = vsel %vm808_vm6, %v1801_v25, %v2760_v59  ;;  %v1804_v41 = vsel %vm808_vm6, %v1802_v61, %v2761_v55  ;;  %2664 = vmatprep.subr.bf16.mxu0 %v2785_v45 }
0x106a   :  { %v1807_v2 = vrot.slane %v1803_v62, 4  ;;  %v1808_v57 = vrot.slane %v1804_v41, 4  ;;  %v2764_v58 = vpop.permute.xlu1 %2763 }
0x106b   :  { %v2766_v33 = vunpack.i.h.bf16 %v2764_v58  ;;  %v2765_v8 = vunpack.i.l.bf16 %v2764_v58 }
0x106c   :  { %v1809_v6 = vsel %vm124_vm2, %v1807_v2, %v1808_v57  ;;  %2665 = vmatpush3.bf16.msra.mxu0 %v2785_v45 }
0x106d   :  { %v1768_v13 = vsel %vm808_vm6, %v1766_v24, %v2766_v33  ;;  %v1769_v17 = vsel %vm808_vm6, %v1767_v3, %v2765_v8  ;;  %v1814_v14 = vpack.c.bf16 %v1809_v6, %v1809_v6  ;;  %2666 = vmatprep.subr.bf16.mxu0 %v2786_v48 }
0x106e   :  { %v1812_v15 = vsel %vm124_vm2, %v1769_v17, %v1807_v2 }
0x106f   :  { %v1813_v10 = vpack.c.bf16 %v1812_v15, %v1768_v13 }
0x1070   :  { %2667 = vmatpush3.bf16.msra.mxu0 %v2786_v48 }
0x1071   :  { %2650 = vmatprep.mubr.msk.bf16.mxu1 %vm204_vm3, %v1813_v10  ;;  %2668 = vmatprep.subr.bf16.mxu0 %v2787_v54 }
0x1072   :  { %2651 = vmatmul.mubr.msk.bf16.vlgmr.msra.gmra.mxu1 %vm204_vm3, %v1814_v14 }
0x1074   :  { %2669 = vmatpush3.bf16.msra.mxu0 %v2787_v54 }
0x1132   :  { %v2652_v9 = vpop.f32.mrf.mxu1 }
0x1133   :  { %v3746_v18 = vadd.f32 %v2652_v9, %v3467_v31 }
0x1134   :  { %v1872_v11 = vpop.f32.mrf.mxu1 }
0x1135   :  { %v3749_v19 = vadd.f32 %v1872_v11, %v3462_v60  ;;  %v1891_v4 = vmul.f32 %v3746_v18, %v3746_v18 }
0x1136   :  { %v2653_v20 = vpop.f32.mrf.mxu1 }
0x1137   :  { %v1889_v21 = vmul.f32 %v3749_v19, %v3749_v19  ;;  %v1898_v60 = vsel %vm204_vm3, %v1891_v4, 0.0 }
0x1138   :  { %v1875_v22 = vpop.f32.mrf.mxu1 }
0x1139   :  { %v3754_v23 = vadd.f32 %v1875_v22, %v3470_v32  ;;  %v1892_v27 = vsel %vm204_vm3, %v1889_v21, 0.0  ;;  %v2782_v32 = vld [vmem:[%s3849_s10 + $0x18] sm:$0xff]  }
0x113a   :  { %1893 = vadd.xlane.f32.xlu0 %v1892_v27  ;;  %2654 = vmatprep.subr.bf16.mxu1 %v2782_v32 }
0x113b   :  { %v1890_v31 = vmul.f32 %v3754_v23, %v3754_v23  ;;  %2655 = vmatpush3.bf16.msra.mxu1 %v2782_v32 }
0x113c   :  { %2656 = vmatprep.subr.bf16.mxu1 %v2783_v63 }
0x113d   :  { %v1895_v28 = vsel %vm204_vm3, %v1890_v31, 0.0 }
0x113e   :  { %1899 = vadd.xlane.f32.xlu0 %v1898_v60  ;;  %1896 = vadd.xlane.f32.xlu1 %v1895_v28 }
0x113f   :  { %2657 = vmatpush3.bf16.msra.mxu1 %v2783_v63 }
0x1140   :  { %2674 = vmatprep.subr.bf16.mxu1 %v3002_v1 }
0x11c3   :  { %v1894_v29 = vpop.xlane.xlu0 %1893 }
0x11c4   :  { %v1901_v12 = vmul.f32 0.03125, %v1894_v29 }
0x11c6   :  { %v1904_v26 = vadd.f32 1e-05, %v1901_v12 }
0x11c7   :  { %v1900_v16 = vpop.xlane.xlu0 %1899  ;;  %v1897_v35 = vpop.xlane.xlu1 %1896 }
0x11c8   :  { %v1903_v37 = vmul.f32 0.03125, %v1900_v16  ;;  %v1902_v38 = vmul.f32 0.03125, %v1897_v35  ;;  %2916 = vrsqrt.f32 %v1904_v26 }
0x11ca   :  { %v1906_v56 = vadd.f32 1e-05, %v1903_v37  ;;  %v1905_v34 = vadd.f32 1e-05, %v1902_v38 }
0x11cc   :  { %2918 = vrsqrt.f32 %v1906_v56 }
0x11cd   :  { %2920 = vrsqrt.f32 %v1905_v34 }
0x11d5   :  { %v2917_v39 = vpop.eup %2916 }
0x11d6   :  { %v1910_v7 = vmul.f32 %v2917_v39, %v3749_v19 }
0x11d8   :  { %v1921_v49 = vmul.f32 %v2371_v36, %v1910_v7 }
0x11d9   :  { %v2919_v40 = vpop.eup %2918 }
0x11da   :  { %v2921_v43 = vpop.eup %2920  ;;  %v1912_v44 = vmul.f32 %v2919_v40, %v3746_v18 }
0x11db   :  { %v1911_v42 = vmul.f32 %v2921_v43, %v3754_v23 }
0x11dc   :  { %v1923_v46 = vmul.f32 %v2371_v36, %v1912_v44 }
0x11dd   :  { %v1922_v50 = vmul.f32 %v2371_v36, %v1911_v42 }
0x11de   :  { %v1925_v51 = vpack.c.bf16 %v1923_v46, %v1923_v46 }
0x11df   :  { %v1924_v47 = vpack.c.bf16 %v1922_v50, %v1921_v49  ;;  %v2398_v50 = vld [vmem:[%s3853_s14] ss:$0 sm:$0xff] }
0x11e1   :  { %2658 = vmatprep.mubr.msk.bf16.mxu1 %vm204_vm3, %v1924_v47 }
0x11e2   :  { %2659 = vmatmul.mubr.msk.bf16.vlgmr.msra.gmra.mxu1 %vm204_vm3, %v1925_v51 }
0x11e3   :  { %2678 = vmatprep.mubr.msk.bf16.mxu1 %vm3003_vm1, %v3002_v1 }
0x12a2   :  { %v2660_v55 = vpop.f32.mrf.mxu1 }
0x12a3   :  { %v2382_v62 = vmul.f32 -1.442695, %v2660_v55 }
0x12a4   :  { %v1983_v59 = vpop.f32.mrf.mxu1 }
0x12a5   :  { %2021 = vrot.lane.b32.xlu0 %v1983_v59, %s3008_s19  ;;  %v2380_v0 = vmul.f32 -1.442695, %v1983_v59 }
0x12a6   :  { %v2661_v61 = vpop.f32.mrf.mxu1 }
0x12a7   :  { %2922 = vpow2.f32 %v2380_v0 }
0x12a8   :  { %v1986_v25 = vpop.f32.mrf.mxu1 }
0x12a9   :  { %2023 = vrot.lane.b32.xlu1 %v1986_v25, %s3008_s19  ;;  %v2381_v53 = vmul.f32 -1.442695, %v1986_v25 }
0x12ab   :  { %2924 = vpow2.f32 %v2381_v53 }
0x12ac   :  { %2926 = vpow2.f32 %v2382_v62 }
0x12ad   :  { %2025 = vrot.lane.b32.xlu1 %v2660_v55, %s3008_s19 }
0x12b4   :  { %v2923_v41 = vpop.eup %2922 }
0x12b5   :  { %v2006_v57 = vadd.f32 1.0, %v2923_v41 }
0x12b7   :  { %2928 = vrcp.f32 %v2006_v57 }
0x12b8   :  { %v2925_v2 = vpop.eup %2924 }
0x12b9   :  { %v2007_v58 = vadd.f32 1.0, %v2925_v2  ;;  %v2927_v5 = vpop.eup %2926 }
0x12ba   :  { %v2008_v30 = vadd.f32 1.0, %v2927_v5 }
0x12bb   :  { %2930 = vrcp.f32 %v2007_v58 }
0x12bc   :  { %2932 = vrcp.f32 %v2008_v30 }
0x12c4   :  { %v2929_v33 = vpop.eup %2928 }
0x12c5   :  { %v2015_v3 = vmul.f32 %v2929_v33, %v1983_v59 }
0x12c8   :  { %v2931_v8 = vpop.eup %2930 }
0x12c9   :  { %v2016_v6 = vmul.f32 %v2931_v8, %v1986_v25  ;;  %v2933_v13 = vpop.eup %2932 }
0x12ca   :  { %v2017_v9 = vmul.f32 %v2933_v13, %v2660_v55 }
0x1317   :  { %v2022_v24 = vpop.permute.xlu0 %2021 }
0x1318   :  { %v2030_v15 = vmul.f32 %v2022_v24, %v2015_v3 }
0x131b   :  { %v2024_v17 = vpop.permute.xlu1 %2023 }
0x131c   :  { %v2031_v10 = vmul.f32 %v2024_v17, %v2016_v6 }
0x131e   :  { %v2033_v14 = vpack.c.bf16 %v2031_v10, %v2030_v15 }
0x131f   :  { %v2026_v11 = vpop.permute.xlu1 %2025 }
0x1320   :  { %v2032_v20 = vmul.f32 %v2026_v11, %v2017_v9  ;;  %2670 = vmatprep.mubr.msk.bf16.mxu0 %vm1105_vm7, %v2033_v14 }
0x1322   :  { %v2034_v21 = vpack.c.bf16 %v2032_v20, %v2032_v20 }
0x1324   :  { %2671 = vmatmul.mubr.msk.bf16.vlgmr.msra.gmra.mxu0 %vm1105_vm7, %v2034_v21 }
0x13e4   :  { %v2672_v22 = vpop.f32.mrf.mxu0 }
0x13e5   :  { %v2124_v60 = vadd.f32 %v2672_v22, %v3746_v18  ;;  %v2789_v18 = vld [vmem:[%s3852_s13] sm:$0xff]  }
0x13e6   :  { %v2108_v27 = vpop.f32.mrf.mxu0 }
0x13e7   :  { %v2122_v4 = vadd.f32 %v2108_v27, %v3749_v19  ;;  %v2128_v12 = vrot.slane %v2124_v60, 4  ;;  %v2788_v19 = vld [vmem:[%s3852_s13 + $0x8] sm:$0xff]  }
0x13e8   :  { %v2673_v31 = vpop.f32.mrf.mxu0  ;;  %2675 = vmatpush3.bf16.msra.mxu1 %v2788_v19 }
0x13e9   :  { %v2131_v28 = vmul.f32 %v2122_v4, %v2122_v4  ;;  %2676 = vmatprep.subr.bf16.mxu1 %v3002_v1  ;;  %v2397_v1 = vld [vmem:[%s3851_s12] ss:$0 sm:$0xff]  ;;  %s2958_s12 = scalar_lea.vmem %s2273_s25, 256 }
0x13ea   :  { %v2111_v32 = vpop.f32.mrf.mxu0  ;;  %p2959_p0 = scmp.ne.s32.totalorder %s2273_s25, %s2958_s12  ;;  %p2964_p2 = scmp.lt.s32.totalorder %s2958_s12, %s2958_s12 }
0x13eb   :  { %v2123_v63 = vadd.f32 %v2111_v32, %v3754_v23  ;;  %v2133_v29 = vsel %vm204_vm3, %v2131_v28, 0.0 }
0x13ec   :  { %2134 = vadd.xlane.f32.xlu0 %v2133_v29  ;;  %2677 = vmatpush3.bf16.msra.mxu1 %v2789_v18  ;;  %p2965_p3 = por %p2964_p2, %p2963_p1 }
0x13ed   :  { %v2127_v26 = vrot.slane %v2123_v63, 4 }
0x13ee   :  { %p2966_p4 = pnand %p2965_p3, %p2959_p0 }
0x13ef   :  { %v2129_v16 = vsel %vm124_vm2, %v2127_v26, %v2128_v12 }
0x13f0   :  { %v2132_v35 = vmul.f32 %v2129_v16, %v2129_v16 }
0x13f2   :  { %v2136_v37 = vsel %vm204_vm3, %v2132_v35, 0.0 }
0x13f3   :  { %2137 = vadd.xlane.f32.xlu1 %v2136_v37 }
0x1475   :  { %v2135_v23 = vpop.xlane.xlu0 %2134 }
0x1476   :  { %v2139_v38 = vmul.f32 0.03125, %v2135_v23 }
0x1478   :  { %v2141_v56 = vadd.f32 1e-05, %v2139_v38 }
0x147a   :  { %2934 = vrsqrt.f32 %v2141_v56 }
0x147c   :  { %v2138_v34 = vpop.xlane.xlu1 %2137 }
0x147d   :  { %v2140_v39 = vmul.f32 0.03125, %v2138_v34 }
0x147f   :  { %v2142_v40 = vadd.f32 1e-05, %v2140_v39 }
0x1481   :  { %2936 = vrsqrt.f32 %v2142_v40 }
0x1487   :  { %v2935_v7 = vpop.eup %2934 }
0x1488   :  { %v2145_v43 = vmul.f32 %v2935_v7, %v2122_v4 }
0x148a   :  { %v2154_v42 = vmul.f32 %v2397_v1, %v2145_v43 }
0x148e   :  { %v2937_v36 = vpop.eup %2936 }
0x148f   :  { %v2146_v44 = vmul.f32 %v2937_v36, %v2129_v16 }
0x1491   :  { %v2155_v46 = vmul.f32 %v2397_v1, %v2146_v44 }
0x1493   :  { %v2156_v49 = vpack.c.bf16 %v2155_v46, %v2154_v42 }
0x1495   :  { %2679 = vmatmul.mubr.msk.bf16.vlgmr.msra.gmra.mxu1 %vm204_vm3, %v2156_v49 }
0x1555   :  { %v2217_v51 = vpop.f32.mrf.mxu1 }
0x1556   :  { %v2218_v47 = vadd.f32 %v2398_v50, %v2217_v51 }
0x1557   :  { %v2680_v52 = vpop.f32.mrf.mxu1 }
0x1558   :  { %v2229_v45 = vand.u32 2147483647, %v2218_v47  ;;  %2224 = vst.msk [vmem:[#allocation2] sm:$0xff] %vm76_vm0, %v2218_v47 }
0x1559   :  { %v2220_v48 = vpop.f32.mrf.mxu1 }
0x155a   :  { %v2230_v54 = vsub.f32 0.0, %v2229_v45  ;;  %v2221_v55 = vadd.f32 %v2398_v50, %v2220_v48 }
0x155b   :  { %v2681_v59 = vpop.f32.mrf.mxu1 }
0x155c   :  { %v2231_v61 = vmul.f32 1.442695, %v2230_v54  ;;  %v2251_v25 = vand.u32 2147483647, %v2221_v55  ;;  %2245 = vst.msk [vmem:[#allocation2 + $0x8] sm:$0xff] %vm76_vm0, %v2221_v55 }
0x155d   :  { %2969 = shalt.err (!%p2966_p4)
}
0x155e   :  { %s3013_s14 = smov 128   ;;  %2938 = vpow2.f32 %v2231_v61  ;;  %v2252_v0 = vsub.f32 0.0, %v2251_v25  ;;  %v2225_v5 = vld [vmem:[%s3854_s15] sm:$0xff]  ;;  %v2226_v30 = vmax.f32 %v2218_v47, 0.0  ;;  %v2402_v6 = vld [vmem:[%s3854_s15 + $0x8] sm:$0xff]  ;;  %v2248_v9 = vmax.f32 %v2221_v55, 0.0 }
0x155f   :  { %2278 = dma.vmem_to_hbm [thread:$0]  %s2273_s25, 256, %s3855_s16, [#allocation3], %s3013_s14, %s3013_s14, %s3009_s1   ;;  %v2227_v33 = vmul.f32 %v2225_v5, %v2218_v47  ;;  %v2249_v11 = vmul.f32 %v2402_v6, %v2221_v55 }
0x1560   :  { %v2253_v53 = vmul.f32 1.442695, %v2252_v0  ;;  %s3014_s10 = smov [#allocation4]  }
0x1561   :  { %v2228_v17 = vsub.f32 %v2226_v30, %v2227_v33  ;;  %s2284_s28 = sshll.u32 %s3014_s10, 4  ;;  %v2250_v60 = vsub.f32 %v2248_v9, %v2249_v11  ;;  %s2285_s28 = int_to_ptr.vmem [resolvable:$true] %s2284_s28 }
0x1562   :  { %2940 = vpow2.f32 %v2253_v53  ;;  %s2978_s15 = scalar_lea.vmem %s2285_s28, 256  ;;  %p2983_p6 = scmp.lt.s32.totalorder %s2285_s28, %s2285_s28 }
0x1563   :  { %p2979_p5 = scmp.ne.s32.totalorder %s2285_s28, %s2978_s15  ;;  %p2984_p7 = scmp.lt.s32.totalorder %s2978_s15, %s2978_s15 }
0x1565   :  { %p2985_p8 = por %p2984_p7, %p2983_p6 }
0x1567   :  { %p2986_p9 = pnand %p2985_p8, %p2979_p5 }
0x156b   :  { %v2939_v62 = vpop.eup %2938 }
0x156c   :  { %v2233_v41 = vadd.f32 1.0, %v2939_v62  ;;  %v2236_v58 = vmul.f32 -0.5, %v2939_v62  ;;  %v2239_v3 = vand.u32 2147483647, %v2939_v62 }
0x156e   :  { %2942 = vlog2.f32 %v2233_v41  ;;  %v2237_v8 = vadd.f32 1.0, %v2236_v58  ;;  %vm2240_vm8 = vcmp.lt.f32.partialorder %v2239_v3, 0.0004427343 }
0x156f   :  { %v2941_v2 = vpop.eup %2940 }
0x1570   :  { %v2255_v57 = vadd.f32 1.0, %v2941_v2  ;;  %v2258_v24 = vmul.f32 -0.5, %v2941_v2  ;;  %v2238_v10 = vmul.f32 %v2939_v62, %v2237_v8  ;;  %v2261_v20 = vand.u32 2147483647, %v2941_v2 }
0x1572   :  { %2944 = vlog2.f32 %v2255_v57  ;;  %v2259_v14 = vadd.f32 1.0, %v2258_v24  ;;  %vm2262_vm9 = vcmp.lt.f32.partialorder %v2261_v20, 0.0004427343 }
0x1574   :  { %v2260_v31 = vmul.f32 %v2941_v2, %v2259_v14 }
0x157b   :  { %v2943_v13 = vpop.eup %2942 }
0x157c   :  { %v2235_v15 = vmul.f32 0.6931472, %v2943_v13 }
0x157e   :  { %v2241_v21 = vsel %vm2240_vm8, %v2238_v10, %v2235_v15 }
0x157f   :  { %v2945_v22 = vpop.eup %2944  ;;  %v2242_v27 = vadd.f32 %v2241_v21, %v2228_v17 }
0x1580   :  { %v2257_v4 = vmul.f32 0.6931472, %v2945_v22 }
0x1581   :  { %2243 = vst.msk [vmem:[#allocation4] sm:$0xff] %vm76_vm0, %v2242_v27 }
0x1582   :  { %v2263_v28 = vsel %vm2262_vm9, %v2260_v31, %v2257_v4 }
0x1583   :  { %v2264_v32 = vadd.f32 %v2263_v28, %v2250_v60 }
0x1585   :  { %2266 = vst.msk [vmem:[#allocation4 + $0x8] sm:$0xff] %vm76_vm0, %v2264_v32 }
0x1586   :  { %2989 = shalt.err (!%p2986_p9)
}
0x1587   :  { %2290 = dma.vmem_to_hbm [thread:$0]  %s2285_s28, 256, %s3856_s17, [#allocation5], %s3013_s14, %s3013_s14, %s3009_s1  }
0x1588   :  { %2998 = dma.done.wait [#allocation3], 256  }
0x1589   :  { %2999 = vsyncadd [#allocation3], 4294967040 }
0x158a   :  { %3000 = dma.done.wait [#allocation5], 256  }
0x158b   :  { %3001 = vsyncadd [#allocation5], 4294967040 }
0x158c   :  { %2297 = vsyncpa [#allocation3], 1 }
0x158d   :  { %2298 = vsyncpa [#allocation5], 1 }

</bundles_post_ra>
